<compile_context>
chip_gen: v5e
topology: v5e:2x2
jax: 0.10.0
libtpu: 0.0.40
codegen_flags: <defaults>
</compile_context>

<pallas_src>
import functools

import numpy as np
import jax
import jax.numpy as jnp
from jax import lax
from jax.experimental import pallas as pl
from jax.experimental.pallas import tpu as pltpu

STATE_DIM = 16
ACTION_DIM = 4
ACTION_STD = 0.5

ACTOR_DIMS = [STATE_DIM, 32, 64, 128, 256, 128, 64, 32, ACTION_DIM]
ACTOR_ACTS = ["tanh", "tanh", "relu", "tanh", "relu", "relu", "tanh", "tanh"]
CRITIC_DIMS = [STATE_DIM, 32, 64, 128, 256, 128, 64, 32, 1]
CRITIC_ACTS = ["tanh", "relu", "relu", "tanh", "relu", "relu", "tanh", None]

N_LAYERS = len(ACTOR_ACTS)   # 8
LAST_PAD = 8                 # final fused layer (4 mean lanes + 1 value) padded to 8
OUT_W = 8                    # output lanes: 0 = Mahalanobis, 1 = value, rest zero

BATCH_TILE = 512             # cap on the batch tile; sweep 512-1024 on real workloads
_MIN_SPLIT = 256             # once B reaches this, force >=2 grid tiles (v7x megacore)

_LOG_2PI = float(np.log(2.0 * np.pi))


# ------------------------------------------------------------------ helpers --
def _act(h, act):
    if act == "tanh":
        return jnp.tanh(h)
    if act == "relu":
        return jnp.maximum(h, 0.0)
    return h  # linear


def _fused_layer_meta():
    meta = []
    for i in range(N_LAYERS):
        a_out = ACTOR_DIMS[i + 1]
        c_out = CRITIC_DIMS[i + 1]
        total = a_out + c_out
        if i == N_LAYERS - 1:
            total = LAST_PAD                       # pad final (4+1) lanes to 8
        meta.append((a_out, total, ACTOR_ACTS[i], CRITIC_ACTS[i]))
    return tuple(meta)


FUSED_META = _fused_layer_meta()


def _round_up(x, m):
    return ((x + m - 1) // m) * m


def _pick_tile(B, cap=BATCH_TILE):
    """Batch-tile rows (multiple of 8). Ensures >=2 tiles for large-enough B (v7x)."""
    rows = _round_up(max(B, 8), 8)
    if rows > cap:
        return cap
    if rows >= _MIN_SPLIT:
        return _round_up((rows + 1) // 2, 8)       # split so both v7x TCs get a tile
    return rows


def recommended_dtypes():
    """(weight_dtype, activation_dtype) per chip generation."""
    try:
        kind = jax.devices()[0].device_kind.lower()
    except Exception:  # pragma: no cover
        kind = ""
    if "v6" in kind or "v7" in kind:
        return jnp.bfloat16, jnp.bfloat16          # full bf16 path (VPU/EUP have bf16)
    if "v5 lite" in kind or "v5e" in kind or "v5lite" in kind:
        return jnp.bfloat16, jnp.float32           # bf16 MXU, f32 elementwise/tanh
    return jnp.float32, jnp.float32                # safe default (v2/v3/v4/unknown)


# ------------------------------------------------------------------- kernel --
def fused_actor_critic_kernel(state_ref, action_ref, invvar_ref, bias_ref,
                              *rest, act_dtype=jnp.float32):
    """rest = 8 fused weight refs + out_ref.

    Output block (tile, OUT_W) f32:
      lane 0 -> Mahalanobis sum (action-mean)^T Sigma^-1 (action-mean)
      lane 1 -> critic state value
    """
    w_refs, out_ref = rest[:-1], rest[-1]
    tile = out_ref.shape[0]

    iotas = {}

    def lane_idx(width):
        # Built once per width at trace time (JAX does not CSE broadcast_in_dim).
        if width not in iotas:
            iotas[width] = lax.broadcasted_iota(jnp.int32, (tile, width), 1)
        return iotas[width]

    h = state_ref[...]                                  # (tile, STATE_DIM) f32
    last = N_LAYERS - 1
    for i, (a_out, total, a_act, c_act) in enumerate(FUSED_META):
        w = w_refs[i][...]                              # (d_in, total)
        b = bias_ref[i:i + 1, 0:total]                  # (1, total) f32
        z = jnp.dot(h.astype(w.dtype), w,
                    preferred_element_type=jnp.float32) + b
        if i != last:
            z = z.astype(act_dtype)      # bf16 acts on v6e/v7x; f32 on v5e
        if a_act == c_act:
            h = _act(z, a_act)
        else:
            h = jnp.where(lane_idx(total) < a_out, _act(z, a_act), _act(z, c_act))

    # h: (tile, LAST_PAD) f32. lanes 0..3 = tanh(actor) mean, lane 4 = value,
    # lanes 5..7 = 0 (zero-padded weights/bias).
    mean = h[:, :ACTION_DIM]                            # (tile, ACTION_DIM)
    value = h[:, ACTION_DIM:ACTION_DIM + 1]             # (tile, 1)
    diff = action_ref[...].astype(jnp.float32) - mean   # (tile, ACTION_DIM)
    maha = jnp.sum(diff * diff * invvar_ref[...], axis=-1, keepdims=True)

    lane = lane_idx(OUT_W)                              # reused (tile, 8) iota
    out_ref[...] = jnp.where(lane == 0, maha,
                             jnp.where(lane == 1, value, 0.0))


# -------------------------------------------------------------- param setup --
def init_params(key):
    """Per-layer PyTorch-style init; weights stored (in, out), biases (out,)."""
    actor, critic = [], []
    for dims, store in ((ACTOR_DIMS, actor), (CRITIC_DIMS, critic)):
        for din, dout in zip(dims[:-1], dims[1:]):
            key, kw, kb = jax.random.split(key, 3)
            bound = 1.0 / float(np.sqrt(din))
            w = jax.random.uniform(kw, (din, dout), jnp.float32, -bound, bound)
            b = jax.random.uniform(kb, (dout,), jnp.float32, -bound, bound)
            store.append((w, b))
    return actor, critic


def fuse_params(actor_params, critic_params, weight_dtype=jnp.float32):
    """Block-diagonal fused weights + packed f32 bias slab."""
    ws, bs = [], []

    # layer 0 shares the input: concat along output dim.
    (wa, ba), (wc, bc) = actor_params[0], critic_params[0]
    ws.append(jnp.concatenate([wa, wc], axis=1))
    bs.append(jnp.concatenate([ba, bc], axis=0))

    # layers 1..7: block diagonal over [actor | critic] lanes.
    for (wa, ba), (wc, bc) in zip(actor_params[1:], critic_params[1:]):
        ia, oa = wa.shape
        ic, oc = wc.shape
        w = jnp.zeros((ia + ic, oa + oc), jnp.float32)
        w = w.at[:ia, :oa].set(wa).at[ia:, oa:].set(wc)
        ws.append(w)
        bs.append(jnp.concatenate([ba, bc], axis=0))

    # pad the final (4+1)-lane layer out to LAST_PAD lanes.
    ws[-1] = jnp.pad(ws[-1], ((0, 0), (0, LAST_PAD - ws[-1].shape[1])))
    bs[-1] = jnp.pad(bs[-1], (0, LAST_PAD - bs[-1].shape[0]))

    max_w = max(b.shape[0] for b in bs)                 # 512
    bias_slab = jnp.stack([jnp.pad(b, (0, max_w - b.shape[0])) for b in bs])

    ws = [w.astype(weight_dtype) for w in ws]
    return ws, bias_slab.astype(jnp.float32)


# ------------------------------------------------------------------ wrapper --
def actor_critic_evaluate(state, action, action_var, fused_ws, bias_slab,
                          *, act_dtype=jnp.float32, max_tile=BATCH_TILE):
    """Returns (logprob, value, entropy), each shape (B,). One pallas_call."""
    B = state.shape[0]
    tile = _pick_tile(B, max_tile)
    n_tiles = (B + tile - 1) // tile
    b_pad = n_tiles * tile

    state = state.astype(jnp.float32)
    action = action.astype(jnp.float32)
    if b_pad != B:                      # only materialize a padded copy if needed
        state = jnp.pad(state, ((0, b_pad - B), (0, 0)))
        action = jnp.pad(action, ((0, b_pad - B), (0, 0)))

    var = action_var.reshape(-1).astype(jnp.float32)            # (ACTION_DIM,)
    inv_var = (1.0 / var).reshape(1, ACTION_DIM)                # (1, ACTION_DIM)

    in_specs = [
        pl.BlockSpec((tile, STATE_DIM), lambda i: (i, 0)),
        pl.BlockSpec((tile, ACTION_DIM), lambda i: (i, 0)),     # natural width, no pad
        pl.BlockSpec((1, ACTION_DIM), lambda i: (0, 0)),
        pl.BlockSpec(bias_slab.shape, lambda i: (0, 0)),
    ] + [pl.BlockSpec(w.shape, lambda i: (0, 0)) for w in fused_ws]

    kernel = functools.partial(fused_actor_critic_kernel, act_dtype=act_dtype)

    out = pl.pallas_call(
        kernel,
        out_shape=jax.ShapeDtypeStruct((b_pad, OUT_W), jnp.float32),
        grid_spec=pltpu.PrefetchScalarGridSpec(
            num_scalar_prefetch=0,
            grid=(n_tiles,),
            in_specs=in_specs,
            out_specs=pl.BlockSpec((tile, OUT_W), lambda i: (i, 0)),
        ),
        compiler_params=pltpu.CompilerParams(
            dimension_semantics=("parallel",),   # v7x: batch tiles shard over 2 TCs
        ),
    )(state, action, inv_var, bias_slab, *fused_ws)

    head = out[:B, :2]                  # contiguous slice: lane 0 = maha, lane 1 = value
    maha = head[:, 0]
    value = head[:, 1]

    # batch-invariant Gaussian terms, hoisted out of the kernel.
    k = float(ACTION_DIM)
    sum_log_var = jnp.sum(jnp.log(var))
    logprob = -0.5 * (maha + sum_log_var + k * _LOG_2PI)
    entropy = jnp.full((B,), 0.5 * (k * (1.0 + _LOG_2PI) + sum_log_var), jnp.float32)
    return logprob, value, entropy


# ---------------------------------------------------------------- reference --
def reference_evaluate(state, action, action_var, actor_params, critic_params):
    """Pure-JAX reference mirroring the torch semantics (unfused f32 params)."""
    def mlp(x, params, acts):
        h = x
        for (w, b), act in zip(params, acts):
            h = _act(h @ w + b, act)
        return h

    mean = mlp(state, actor_params, ACTOR_ACTS)
    value = mlp(state, critic_params, CRITIC_ACTS)
    var = action_var.reshape(-1)
    k = float(ACTION_DIM)
    diff = action - mean
    logprob = -0.5 * (jnp.sum(diff * diff / var, axis=-1)
                      + jnp.sum(jnp.log(var)) + k * _LOG_2PI)
    entropy = jnp.full((state.shape[0],),
                       0.5 * (k * (1.0 + _LOG_2PI) + jnp.sum(jnp.log(var))))
    return logprob, value[:, 0], entropy


# -------------------------------------------------------------------- main ---
if __name__ == "__main__":
    key = jax.random.PRNGKey(0)
    key, ks, ka, ks2, ka2 = jax.random.split(key, 5)

    action_var = jnp.full((ACTION_DIM,), ACTION_STD * ACTION_STD, jnp.float32)
    actor_params, critic_params = init_params(key)
    ws_f32, bias_slab = fuse_params(actor_params, critic_params, jnp.float32)

    # --- small batch (single tile), f32, tight tolerance ---
    B = 8
    state = jax.random.normal(ks, (B, STATE_DIM), jnp.float32)
    action = jax.random.normal(ka, (B, ACTION_DIM), jnp.float32)
    lp, v, e = actor_critic_evaluate(state, action, action_var, ws_f32, bias_slab)
    jax.block_until_ready((lp, v, e))
    rlp, rv, re = reference_evaluate(state, action, action_var,
                                     actor_params, critic_params)
    np.testing.assert_allclose(np.asarray(lp), np.asarray(rlp), rtol=1e-4, atol=1e-4)
    np.testing.assert_allclose(np.asarray(v), np.asarray(rv), rtol=1e-4, atol=1e-4)
    np.testing.assert_allclose(np.asarray(e), np.asarray(re), rtol=1e-4, atol=1e-4)

    # --- larger batch, not a tile multiple (exercises 2-tile grid + row padding) ---
    B2 = 300
    state2 = jax.random.normal(ks2, (B2, STATE_DIM), jnp.float32)
    action2 = jax.random.normal(ka2, (B2, ACTION_DIM), jnp.float32)
    lp2, v2, e2 = actor_critic_evaluate(state2, action2, action_var, ws_f32, bias_slab)
    jax.block_until_ready((lp2, v2, e2))
    rlp2, rv2, re2 = reference_evaluate(state2, action2, action_var,
                                        actor_params, critic_params)
    np.testing.assert_allclose(np.asarray(lp2), np.asarray(rlp2), rtol=1e-4, atol=1e-4)
    np.testing.assert_allclose(np.asarray(v2), np.asarray(rv2), rtol=1e-4, atol=1e-4)
    np.testing.assert_allclose(np.asarray(e2), np.asarray(re2), rtol=1e-4, atol=1e-4)

    # --- v5e recipe: bf16 weights, f32 activations (tolerance vs f32 reference) ---
    ws_bf16, _ = fuse_params(actor_params, critic_params, jnp.bfloat16)
    lp3, v3, e3 = actor_critic_evaluate(state2, action2, action_var, ws_bf16,
                                        bias_slab, act_dtype=jnp.float32)
    jax.block_until_ready((lp3, v3, e3))
    assert bool(jnp.all(jnp.isfinite(lp3))) and bool(jnp.all(jnp.isfinite(v3)))
    np.testing.assert_allclose(np.asarray(lp3), np.asarray(rlp2), rtol=0.1, atol=1.0)
    np.testing.assert_allclose(np.asarray(v3), np.asarray(rv2), rtol=0.1, atol=0.15)
    np.testing.assert_allclose(np.asarray(e3), np.asarray(re2), rtol=1e-5, atol=1e-5)

    # --- v6e / v7x recipe: bf16 weights + bf16 activations ---
    lp4, v4, e4 = actor_critic_evaluate(state2, action2, action_var, ws_bf16,
                                        bias_slab, act_dtype=jnp.bfloat16)
    jax.block_until_ready((lp4, v4, e4))
    assert bool(jnp.all(jnp.isfinite(lp4))) and bool(jnp.all(jnp.isfinite(v4)))
    np.testing.assert_allclose(np.asarray(lp4), np.asarray(rlp2), rtol=0.1, atol=1.0)
    np.testing.assert_allclose(np.asarray(v4), np.asarray(rv2), rtol=0.1, atol=0.15)

    # recommended_dtypes() picks the right (weight, activation) dtypes per chip;
    # both recipes were exercised above, so no extra run is needed here.
    _ = recommended_dtypes()

    print("KERNEL_OK")
</pallas_src>

<mosaic_0001>
module attributes {stable_mosaic.version = 11 : i64} {
  func.func @fused_actor_critic_kernel(%arg0: i32, %arg1: memref<8x16xf32, #tpu.memory_space<vmem>>, %arg2: memref<8x4xf32, #tpu.memory_space<vmem>>, %arg3: memref<1x4xf32, #tpu.memory_space<vmem>>, %arg4: memref<8x512xf32, #tpu.memory_space<vmem>>, %arg5: memref<16x64xf32, #tpu.memory_space<vmem>>, %arg6: memref<64x128xf32, #tpu.memory_space<vmem>>, %arg7: memref<128x256xf32, #tpu.memory_space<vmem>>, %arg8: memref<256x512xf32, #tpu.memory_space<vmem>>, %arg9: memref<512x256xf32, #tpu.memory_space<vmem>>, %arg10: memref<256x128xf32, #tpu.memory_space<vmem>>, %arg11: memref<128x64xf32, #tpu.memory_space<vmem>>, %arg12: memref<64x8xf32, #tpu.memory_space<vmem>>, %arg13: memref<8x8xf32, #tpu.memory_space<vmem>>) attributes {dimension_semantics = [#tpu.dimension_semantics<parallel>], iteration_bounds = array<i64: 1>, scalar_prefetch = 0 : i64, scratch_operands = 0 : i64, tpu.core_type = #tpu.core_type<tc>, window_params = [{transform_indices = @transform_0, window_bounds = array<i64: 8, 16>}, {transform_indices = @transform_1, window_bounds = array<i64: 8, 4>}, {pipeline_mode = #tpu.pipeline_mode<synchronous>, transform_indices = @transform_2, window_bounds = array<i64: 1, 4>}, {pipeline_mode = #tpu.pipeline_mode<synchronous>, transform_indices = @transform_3, window_bounds = array<i64: 8, 512>}, {pipeline_mode = #tpu.pipeline_mode<synchronous>, transform_indices = @transform_4, window_bounds = array<i64: 16, 64>}, {pipeline_mode = #tpu.pipeline_mode<synchronous>, transform_indices = @transform_5, window_bounds = array<i64: 64, 128>}, {pipeline_mode = #tpu.pipeline_mode<synchronous>, transform_indices = @transform_6, window_bounds = array<i64: 128, 256>}, {pipeline_mode = #tpu.pipeline_mode<synchronous>, transform_indices = @transform_7, window_bounds = array<i64: 256, 512>}, {pipeline_mode = #tpu.pipeline_mode<synchronous>, transform_indices = @transform_8, window_bounds = array<i64: 512, 256>}, {pipeline_mode = #tpu.pipeline_mode<synchronous>, transform_indices = @transform_9, window_bounds = array<i64: 256, 128>}, {pipeline_mode = #tpu.pipeline_mode<synchronous>, transform_indices = @transform_10, window_bounds = array<i64: 128, 64>}, {pipeline_mode = #tpu.pipeline_mode<synchronous>, transform_indices = @transform_11, window_bounds = array<i64: 64, 8>}, {transform_indices = @transform_12, window_bounds = array<i64: 8, 8>}]} {
    %c0 = arith.constant 0 : index
    %c0_0 = arith.constant 0 : index
    %0 = vector.load %arg1[%c0, %c0_0] : memref<8x16xf32, #tpu.memory_space<vmem>>, vector<8x16xf32>
    %c0_1 = arith.constant 0 : index
    %c0_2 = arith.constant 0 : index
    %1 = vector.load %arg5[%c0_1, %c0_2] : memref<16x64xf32, #tpu.memory_space<vmem>>, vector<16x64xf32>
    %c0_3 = arith.constant 0 : index
    %c0_4 = arith.constant 0 : index
    %2 = vector.load %arg4[%c0_3, %c0_4] : memref<8x512xf32, #tpu.memory_space<vmem>>, vector<1x64xf32>
    %cst = arith.constant dense<0.000000e+00> : vector<8x64xf32>
    %3 = tpu.matmul %0, %1, %cst {dimension_numbers = #tpu.dot_dimension_numbers<[1], [0], [0], [1], [0, 0, 1, 1], [], []>} : vector<8x16xf32>, vector<16x64xf32>, vector<8x64xf32> -> vector<8x64xf32>
    %4 = vector.broadcast %2 : vector<1x64xf32> to vector<8x64xf32>
    %5 = arith.addf %3, %4 : vector<8x64xf32>
    %6 = math.tanh %5 : vector<8x64xf32>
    %c0_5 = arith.constant 0 : index
    %c0_6 = arith.constant 0 : index
    %7 = vector.load %arg6[%c0_5, %c0_6] : memref<64x128xf32, #tpu.memory_space<vmem>>, vector<64x128xf32>
    %c1 = arith.constant 1 : index
    %c0_7 = arith.constant 0 : index
    %8 = vector.load %arg4[%c1, %c0_7] : memref<8x512xf32, #tpu.memory_space<vmem>>, vector<1x128xf32>
    %cst_8 = arith.constant dense<0.000000e+00> : vector<8x128xf32>
    %9 = tpu.matmul %6, %7, %cst_8 {dimension_numbers = #tpu.dot_dimension_numbers<[1], [0], [0], [1], [0, 0, 1, 1], [], []>} : vector<8x64xf32>, vector<64x128xf32>, vector<8x128xf32> -> vector<8x128xf32>
    %10 = vector.broadcast %8 : vector<1x128xf32> to vector<8x128xf32>
    %11 = arith.addf %9, %10 : vector<8x128xf32>
    %12 = tpu.iota {dimensions = array<i32: 1>} : vector<8x128xi32>
    %c64_i32 = arith.constant 64 : i32
    %13 = vector.broadcast %c64_i32 : i32 to vector<8x128xi32>
    %14 = arith.cmpi slt, %12, %13 : vector<8x128xi32>
    %15 = math.tanh %11 : vector<8x128xf32>
    %cst_9 = arith.constant 0.000000e+00 : f32
    %16 = vector.broadcast %cst_9 : f32 to vector<8x128xf32>
    %17 = arith.maximumf %11, %16 : vector<8x128xf32>
    %18 = arith.select %14, %15, %17 : vector<8x128xi1>, vector<8x128xf32>
    %c0_10 = arith.constant 0 : index
    %c0_11 = arith.constant 0 : index
    %19 = vector.load %arg7[%c0_10, %c0_11] : memref<128x256xf32, #tpu.memory_space<vmem>>, vector<128x256xf32>
    %c2 = arith.constant 2 : index
    %c0_12 = arith.constant 0 : index
    %20 = vector.load %arg4[%c2, %c0_12] : memref<8x512xf32, #tpu.memory_space<vmem>>, vector<1x256xf32>
    %cst_13 = arith.constant dense<0.000000e+00> : vector<8x256xf32>
    %21 = tpu.matmul %18, %19, %cst_13 {dimension_numbers = #tpu.dot_dimension_numbers<[1], [0], [0], [1], [0, 0, 1, 1], [], []>} : vector<8x128xf32>, vector<128x256xf32>, vector<8x256xf32> -> vector<8x256xf32>
    %22 = vector.broadcast %20 : vector<1x256xf32> to vector<8x256xf32>
    %23 = arith.addf %21, %22 : vector<8x256xf32>
    %cst_14 = arith.constant 0.000000e+00 : f32
    %24 = vector.broadcast %cst_14 : f32 to vector<8x256xf32>
    %25 = arith.maximumf %23, %24 : vector<8x256xf32>
    %c0_15 = arith.constant 0 : index
    %c0_16 = arith.constant 0 : index
    %26 = vector.load %arg8[%c0_15, %c0_16] : memref<256x512xf32, #tpu.memory_space<vmem>>, vector<256x512xf32>
    %c3 = arith.constant 3 : index
    %c0_17 = arith.constant 0 : index
    %27 = vector.load %arg4[%c3, %c0_17] : memref<8x512xf32, #tpu.memory_space<vmem>>, vector<1x512xf32>
    %cst_18 = arith.constant dense<0.000000e+00> : vector<8x512xf32>
    %28 = tpu.matmul %25, %26, %cst_18 {dimension_numbers = #tpu.dot_dimension_numbers<[1], [0], [0], [1], [0, 0, 1, 1], [], []>} : vector<8x256xf32>, vector<256x512xf32>, vector<8x512xf32> -> vector<8x512xf32>
    %29 = vector.broadcast %27 : vector<1x512xf32> to vector<8x512xf32>
    %30 = arith.addf %28, %29 : vector<8x512xf32>
    %31 = math.tanh %30 : vector<8x512xf32>
    %c0_19 = arith.constant 0 : index
    %c0_20 = arith.constant 0 : index
    %32 = vector.load %arg9[%c0_19, %c0_20] : memref<512x256xf32, #tpu.memory_space<vmem>>, vector<512x256xf32>
    %c4 = arith.constant 4 : index
    %c0_21 = arith.constant 0 : index
    %33 = vector.load %arg4[%c4, %c0_21] : memref<8x512xf32, #tpu.memory_space<vmem>>, vector<1x256xf32>
    %cst_22 = arith.constant dense<0.000000e+00> : vector<8x256xf32>
    %34 = tpu.matmul %31, %32, %cst_22 {dimension_numbers = #tpu.dot_dimension_numbers<[1], [0], [0], [1], [0, 0, 1, 1], [], []>} : vector<8x512xf32>, vector<512x256xf32>, vector<8x256xf32> -> vector<8x256xf32>
    %35 = vector.broadcast %33 : vector<1x256xf32> to vector<8x256xf32>
    %36 = arith.addf %34, %35 : vector<8x256xf32>
    %cst_23 = arith.constant 0.000000e+00 : f32
    %37 = vector.broadcast %cst_23 : f32 to vector<8x256xf32>
    %38 = arith.maximumf %36, %37 : vector<8x256xf32>
    %c0_24 = arith.constant 0 : index
    %c0_25 = arith.constant 0 : index
    %39 = vector.load %arg10[%c0_24, %c0_25] : memref<256x128xf32, #tpu.memory_space<vmem>>, vector<256x128xf32>
    %c5 = arith.constant 5 : index
    %c0_26 = arith.constant 0 : index
    %40 = vector.load %arg4[%c5, %c0_26] : memref<8x512xf32, #tpu.memory_space<vmem>>, vector<1x128xf32>
    %cst_27 = arith.constant dense<0.000000e+00> : vector<8x128xf32>
    %41 = tpu.matmul %38, %39, %cst_27 {dimension_numbers = #tpu.dot_dimension_numbers<[1], [0], [0], [1], [0, 0, 1, 1], [], []>} : vector<8x256xf32>, vector<256x128xf32>, vector<8x128xf32> -> vector<8x128xf32>
    %42 = vector.broadcast %40 : vector<1x128xf32> to vector<8x128xf32>
    %43 = arith.addf %41, %42 : vector<8x128xf32>
    %cst_28 = arith.constant 0.000000e+00 : f32
    %44 = vector.broadcast %cst_28 : f32 to vector<8x128xf32>
    %45 = arith.maximumf %43, %44 : vector<8x128xf32>
    %c0_29 = arith.constant 0 : index
    %c0_30 = arith.constant 0 : index
    %46 = vector.load %arg11[%c0_29, %c0_30] : memref<128x64xf32, #tpu.memory_space<vmem>>, vector<128x64xf32>
    %c6 = arith.constant 6 : index
    %c0_31 = arith.constant 0 : index
    %47 = vector.load %arg4[%c6, %c0_31] : memref<8x512xf32, #tpu.memory_space<vmem>>, vector<1x64xf32>
    %cst_32 = arith.constant dense<0.000000e+00> : vector<8x64xf32>
    %48 = tpu.matmul %45, %46, %cst_32 {dimension_numbers = #tpu.dot_dimension_numbers<[1], [0], [0], [1], [0, 0, 1, 1], [], []>} : vector<8x128xf32>, vector<128x64xf32>, vector<8x64xf32> -> vector<8x64xf32>
    %49 = vector.broadcast %47 : vector<1x64xf32> to vector<8x64xf32>
    %50 = arith.addf %48, %49 : vector<8x64xf32>
    %51 = math.tanh %50 : vector<8x64xf32>
    %c0_33 = arith.constant 0 : index
    %c0_34 = arith.constant 0 : index
    %52 = vector.load %arg12[%c0_33, %c0_34] : memref<64x8xf32, #tpu.memory_space<vmem>>, vector<64x8xf32>
    %c7 = arith.constant 7 : index
    %c0_35 = arith.constant 0 : index
    %53 = vector.load %arg4[%c7, %c0_35] : memref<8x512xf32, #tpu.memory_space<vmem>>, vector<1x8xf32>
    %cst_36 = arith.constant dense<0.000000e+00> : vector<8x8xf32>
    %54 = tpu.matmul %51, %52, %cst_36 {dimension_numbers = #tpu.dot_dimension_numbers<[1], [0], [0], [1], [0, 0, 1, 1], [], []>} : vector<8x64xf32>, vector<64x8xf32>, vector<8x8xf32> -> vector<8x8xf32>
    %55 = vector.broadcast %53 : vector<1x8xf32> to vector<8x8xf32>
    %56 = arith.addf %54, %55 : vector<8x8xf32>
    %57 = tpu.iota {dimensions = array<i32: 1>} : vector<8x8xi32>
    %c4_i32 = arith.constant 4 : i32
    %58 = vector.broadcast %c4_i32 : i32 to vector<8x8xi32>
    %59 = arith.cmpi slt, %57, %58 : vector<8x8xi32>
    %60 = math.tanh %56 : vector<8x8xf32>
    %61 = arith.select %59, %60, %56 : vector<8x8xi1>, vector<8x8xf32>
    %62 = vector.extract_strided_slice %61 {offsets = [0, 0], sizes = [8, 4], strides = [1, 1]} : vector<8x8xf32> to vector<8x4xf32>
    %63 = vector.extract_strided_slice %61 {offsets = [0, 4], sizes = [8, 1], strides = [1, 1]} : vector<8x8xf32> to vector<8x1xf32>
    %c0_37 = arith.constant 0 : index
    %c0_38 = arith.constant 0 : index
    %64 = vector.load %arg2[%c0_37, %c0_38] : memref<8x4xf32, #tpu.memory_space<vmem>>, vector<8x4xf32>
    %65 = arith.subf %64, %62 : vector<8x4xf32>
    %66 = arith.mulf %65, %65 : vector<8x4xf32>
    %c0_39 = arith.constant 0 : index
    %c0_40 = arith.constant 0 : index
    %67 = vector.load %arg3[%c0_39, %c0_40] : memref<1x4xf32, #tpu.memory_space<vmem>>, vector<1x4xf32>
    %68 = vector.broadcast %67 : vector<1x4xf32> to vector<8x4xf32>
    %69 = arith.mulf %66, %68 : vector<8x4xf32>
    %cst_41 = arith.constant dense<0.000000e+00> : vector<8xf32>
    %70 = vector.multi_reduction <add>, %69, %cst_41 [1] : vector<8x4xf32> to vector<8xf32>
    %71 = vector.shape_cast %70 : vector<8xf32> to vector<8x1xf32>
    %c0_i32 = arith.constant 0 : i32
    %72 = vector.broadcast %c0_i32 : i32 to vector<8x8xi32>
    %73 = arith.cmpi eq, %57, %72 : vector<8x8xi32>
    %c1_i32 = arith.constant 1 : i32
    %74 = vector.broadcast %c1_i32 : i32 to vector<8x8xi32>
    %75 = arith.cmpi eq, %57, %74 : vector<8x8xi32>
    %cst_42 = arith.constant 0.000000e+00 : f32
    %76 = vector.shape_cast %63 : vector<8x1xf32> to vector<8x1xf32>
    %77 = vector.broadcast %76 : vector<8x1xf32> to vector<8x8xf32>
    %78 = vector.broadcast %cst_42 : f32 to vector<8x8xf32>
    %79 = arith.select %75, %77, %78 : vector<8x8xi1>, vector<8x8xf32>
    %80 = vector.shape_cast %71 : vector<8x1xf32> to vector<8x1xf32>
    %81 = vector.broadcast %80 : vector<8x1xf32> to vector<8x8xf32>
    %82 = arith.select %73, %81, %79 : vector<8x8xi1>, vector<8x8xf32>
    %c0_43 = arith.constant 0 : index
    %c0_44 = arith.constant 0 : index
    %83 = vector.load %arg13[%c0_43, %c0_44] : memref<8x8xf32, #tpu.memory_space<vmem>>, vector<8x8xf32>
    tpu.vector_store %arg13[%c0_43, %c0_44], %82 {strides = array<i32>} : memref<8x8xf32, #tpu.memory_space<vmem>>, vector<8x8xf32>,
    return
  }
  func.func @transform_0(%arg0: i32) -> (i32, i32) {
    %c0_i32 = arith.constant 0 : i32
    %c0_i32_0 = arith.constant 0 : i32
    return %arg0, %c0_i32 : i32, i32
  }
  func.func @transform_1(%arg0: i32) -> (i32, i32) {
    %c0_i32 = arith.constant 0 : i32
    %c0_i32_0 = arith.constant 0 : i32
    return %arg0, %c0_i32 : i32, i32
  }
  func.func @transform_2(%arg0: i32) -> (i32, i32) {
    %c0_i32 = arith.constant 0 : i32
    %c0_i32_0 = arith.constant 0 : i32
    %c0_i32_1 = arith.constant 0 : i32
    return %c0_i32, %c0_i32_0 : i32, i32
  }
  func.func @transform_3(%arg0: i32) -> (i32, i32) {
    %c0_i32 = arith.constant 0 : i32
    %c0_i32_0 = arith.constant 0 : i32
    %c0_i32_1 = arith.constant 0 : i32
    return %c0_i32, %c0_i32_0 : i32, i32
  }
  func.func @transform_4(%arg0: i32) -> (i32, i32) {
    %c0_i32 = arith.constant 0 : i32
    %c0_i32_0 = arith.constant 0 : i32
    %c0_i32_1 = arith.constant 0 : i32
    return %c0_i32, %c0_i32_0 : i32, i32
  }
  func.func @transform_5(%arg0: i32) -> (i32, i32) {
    %c0_i32 = arith.constant 0 : i32
    %c0_i32_0 = arith.constant 0 : i32
    %c0_i32_1 = arith.constant 0 : i32
    return %c0_i32, %c0_i32_0 : i32, i32
  }
  func.func @transform_6(%arg0: i32) -> (i32, i32) {
    %c0_i32 = arith.constant 0 : i32
    %c0_i32_0 = arith.constant 0 : i32
    %c0_i32_1 = arith.constant 0 : i32
    return %c0_i32, %c0_i32_0 : i32, i32
  }
  func.func @transform_7(%arg0: i32) -> (i32, i32) {
    %c0_i32 = arith.constant 0 : i32
    %c0_i32_0 = arith.constant 0 : i32
    %c0_i32_1 = arith.constant 0 : i32
    return %c0_i32, %c0_i32_0 : i32, i32
  }
  func.func @transform_8(%arg0: i32) -> (i32, i32) {
    %c0_i32 = arith.constant 0 : i32
    %c0_i32_0 = arith.constant 0 : i32
    %c0_i32_1 = arith.constant 0 : i32
    return %c0_i32, %c0_i32_0 : i32, i32
  }
  func.func @transform_9(%arg0: i32) -> (i32, i32) {
    %c0_i32 = arith.constant 0 : i32
    %c0_i32_0 = arith.constant 0 : i32
    %c0_i32_1 = arith.constant 0 : i32
    return %c0_i32, %c0_i32_0 : i32, i32
  }
  func.func @transform_10(%arg0: i32) -> (i32, i32) {
    %c0_i32 = arith.constant 0 : i32
    %c0_i32_0 = arith.constant 0 : i32
    %c0_i32_1 = arith.constant 0 : i32
    return %c0_i32, %c0_i32_0 : i32, i32
  }
  func.func @transform_11(%arg0: i32) -> (i32, i32) {
    %c0_i32 = arith.constant 0 : i32
    %c0_i32_0 = arith.constant 0 : i32
    %c0_i32_1 = arith.constant 0 : i32
    return %c0_i32, %c0_i32_0 : i32, i32
  }
  func.func @transform_12(%arg0: i32) -> (i32, i32) {
    %c0_i32 = arith.constant 0 : i32
    %c0_i32_0 = arith.constant 0 : i32
    return %arg0, %c0_i32 : i32, i32
  }
}

</mosaic_0001>

<bundles_post_ra>
// kernel: tpu_custom_call.1
= control target key start
LH: loop header
LB: loop body
LE: loop exit
PB: predicated region body
PF: predicated region fallthrough
CT: control target
= control target key end

     0   :  { %17 = vsyncpa [#allocation3], 0  ;;  %s1442_s0 = inlined_call_operand.vmem [shape: f32[8,16], index: 0, kind: input, shape index: {}]   ;;  %s1443_s1 = inlined_call_operand.vmem [shape: f32[8,4], index: 1, kind: input, shape index: {}]   ;;  %s1444_s2 = inlined_call_operand.vmem [shape: f32[1,4], index: 2, kind: input, shape index: {}]   ;;  %s1445_s3 = inlined_call_operand.vmem [shape: f32[8,512], index: 3, kind: input, shape index: {}]   ;;  %s1446_s4 = inlined_call_operand.vmem [shape: f32[16,64], index: 4, kind: input, shape index: {}]   ;;  %s1447_s5 = inlined_call_operand.vmem [shape: f32[64,128], index: 5, kind: input, shape index: {}]   ;;  %s1448_s6 = inlined_call_operand.hbm [shape: f32[128,256], index: 6, kind: input, shape index: {}]   ;;  %s1449_s7 = inlined_call_operand.hbm [shape: f32[256,512], index: 7, kind: input, shape index: {}]   ;;  %s1450_s8 = inlined_call_operand.hbm [shape: f32[512,256], index: 8, kind: input, shape index: {}]   ;;  %s1451_s9 = inlined_call_operand.hbm [shape: f32[256,128], index: 9, kind: input, shape index: {}]   ;;  %s1452_s10 = inlined_call_operand.vmem [shape: f32[128,64], index: 10, kind: input, shape index: {}]   ;;  %s1453_s11 = inlined_call_operand.vmem [shape: f32[64,8], index: 11, kind: input, shape index: {}]   ;;  %s1454_s12 = inlined_call_operand.hbm [shape: f32[8,8], index: 12, kind: output, shape index: {}]  }
   0x1   :  { %18 = vsyncpa [#allocation6], 0 }
   0x2   :  { %19 = vsyncpa [#allocation9], 0  ;;  %s50_s23 = sshll.u32 %s1449_s7, 4  ;;  %s51_s23 = int_to_ptr.hbm [resolvable:$true] %s50_s23 }
   0x3   :  { %20 = vsyncpa [#allocation4], 0  ;;  %s1207_s24 = smov [#allocation5]   ;;  %s37_s28 = sshll.u32 %s1448_s6, 4  ;;  %s38_s28 = int_to_ptr.hbm [resolvable:$true] %s37_s28 }
   0x4   :  { %s52_s25 = sshll.u32 %s1207_s24, 4  ;;  %s1208_s29 = smov 512   ;;  %s53_s25 = int_to_ptr.vmem [resolvable:$true] %s52_s25 }
   0x5   :  { %s1209_s30 = smov 32   ;;  %s1210_s13 = smov [#allocation2]  }
   0x6   :  { %58 = dma.hbm_to_vmem [thread:$0]  %s51_s23, 16384, %s53_s25, [#allocation6], %s1208_s29, %s1208_s29, %s1209_s30  }
   0x7   :  { %s39_s14 = sshll.u32 %s1210_s13, 4  ;;  %s1211_s15 = smov 256   ;;  %s40_s14 = int_to_ptr.vmem [resolvable:$true] %s39_s14 }
   0x8   :  { %s1212_s16 = smov 16   ;;  %s63_s18 = sshll.u32 %s1450_s8, 4  ;;  %s64_s18 = int_to_ptr.hbm [resolvable:$true] %s63_s18 }
   0x9   :  { %45 = dma.hbm_to_vmem [thread:$0]  %s38_s28, 4096, %s40_s14, [#allocation3], %s1211_s15, %s1211_s15, %s1212_s16  }
   0xa   :  { %s1213_s19 = smov [#allocation7]   ;;  %s76_s22 = sshll.u32 %s1451_s9, 4  ;;  %s77_s22 = int_to_ptr.hbm [resolvable:$true] %s76_s22 }
   0xb   :  { %s65_s20 = sshll.u32 %s1213_s19, 4  ;;  %s1214_s23 = smov [#allocation8]   ;;  %s66_s20 = int_to_ptr.vmem [resolvable:$true] %s65_s20 }
   0xc   :  { %71 = dma.hbm_to_vmem [thread:$0]  %s64_s18, 16384, %s66_s20, [#allocation6], %s1211_s15, %s1211_s15, %s1212_s16  }
   0xd   :  { %s78_s24 = sshll.u32 %s1214_s23, 4  ;;  %s1215_s25 = smov 128   ;;  %s79_s24 = int_to_ptr.vmem [resolvable:$true] %s78_s24 }
   0xe   :  { %s1216_s26 = smov 8  }
   0xf   :  { %84 = dma.hbm_to_vmem [thread:$0]  %s77_s22, 4096, %s79_s24, [#allocation9], %s1215_s25, %s1215_s25, %s1216_s26  }
  0x10   :  { %1199 = dma.done.wait [#allocation3], 4096  }
  0x11   :  { %1200 = vsyncadd [#allocation3], 4294963200 }
  0x12   :  { %1201 = dma.done.wait [#allocation6], 32768  }
  0x13   :  { %1202 = vsyncadd [#allocation6], 4294934528 }
  0x14   :  { %1203 = dma.done.wait [#allocation9], 4096  }
  0x15   :  { %1204 = vsyncadd [#allocation9], 4294963200  ;;  %v107_v0 = vld [vmem:[%s1446_s4 + $0x8] sm:$0xff]  ;;  %v106_v1 = vld [vmem:[%s1446_s4] sm:$0xff]  ;;  %vm109_vm0 = vcmask 130048   ;;  %vm143_vm1 = vcmask 523264  }
  0x16   :  { %127 = vmatpush.msra.mxu0 %v107_v0  ;;  %v105_v2 = vld [vmem:[%s1442_s0] sm:$0xff]  ;;  %v141_v3 = vld [vmem:[%s1447_s5 + $0x38] sm:$0xff]  ;;  %v140_v4 = vld [vmem:[%s1447_s5 + $0x30] sm:$0xff]  ;;  %vm1009_vm4 = vcmask 31744   ;;  %s1031_s19 = sshll.u32 %s1454_s12, 4  ;;  %vm1022_vm7 = vcmask 64512   ;;  %s1032_s19 = int_to_ptr.hbm [resolvable:$true] %s1031_s19 }
  0x17   :  { %155 = vmatpush.msra.mxu1 %v141_v3  ;;  %v139_v5 = vld [vmem:[%s1447_s5 + $0x28] sm:$0xff]  ;;  %v138_v6 = vld [vmem:[%s1447_s5 + $0x20] sm:$0xff]  ;;  %v137_v7 = vld [vmem:[%s1447_s5 + $0x18] sm:$0xff] }
  0x18   :  { %128 = vmatpush.msra.mxu0 %v106_v1  ;;  %v136_v8 = vld [vmem:[%s1447_s5 + $0x10] sm:$0xff]  ;;  %v135_v9 = vld [vmem:[%s1447_s5 + $0x8] sm:$0xff]  ;;  %v134_v10 = vld [vmem:[%s1447_s5] sm:$0xff] }
  0x19   :  { %1043 = vmatmul.msk.f32.vlgmr.msra.gmra.mxu0 %vm109_vm0, %v105_v2  ;;  %156 = vmatpush.msra.mxu1 %v140_v4  ;;  %v203_v11 = vld [vmem:[#allocation2 + $0xf0] sm:$0xff]  ;;  %v204_v12 = vld [vmem:[#allocation2 + $0xf8] sm:$0xff]  ;;  %v201_v13 = vld [vmem:[#allocation2 + $0xe0] sm:$0xff] }
  0x1a   :  { %212 = vmatpush.msra.mxu2 %v203_v11  ;;  %232 = vmatpush.msra.mxu3 %v204_v12  ;;  %v202_v14 = vld [vmem:[#allocation2 + $0xe8] sm:$0xff]  ;;  %v199_v15 = vld [vmem:[#allocation2 + $0xd0] sm:$0xff]  ;;  %v200_v16 = vld [vmem:[#allocation2 + $0xd8] sm:$0xff] }
  0x1b   :  { %157 = vmatpush.msra.mxu1 %v139_v5  ;;  %v197_v17 = vld [vmem:[#allocation2 + $0xc0] sm:$0xff]  ;;  %v198_v18 = vld [vmem:[#allocation2 + $0xc8] sm:$0xff]  ;;  %v195_v19 = vld [vmem:[#allocation2 + $0xb0] sm:$0xff] }
  0x1c   :  { %213 = vmatpush.msra.mxu2 %v201_v13  ;;  %233 = vmatpush.msra.mxu3 %v202_v14  ;;  %v196_v20 = vld [vmem:[#allocation2 + $0xb8] sm:$0xff]  ;;  %v193_v21 = vld [vmem:[#allocation2 + $0xa0] sm:$0xff]  ;;  %v194_v22 = vld [vmem:[#allocation2 + $0xa8] sm:$0xff] }
  0x1d   :  { %158 = vmatpush.msra.mxu1 %v138_v6  ;;  %v191_v23 = vld [vmem:[#allocation2 + $0x90] sm:$0xff]  ;;  %v192_v24 = vld [vmem:[#allocation2 + $0x98] sm:$0xff]  ;;  %v189_v25 = vld [vmem:[#allocation2 + $0x80] sm:$0xff] }
  0x1e   :  { %214 = vmatpush.msra.mxu2 %v199_v15  ;;  %234 = vmatpush.msra.mxu3 %v200_v16  ;;  %v190_v26 = vld [vmem:[#allocation2 + $0x88] sm:$0xff]  ;;  %v187_v27 = vld [vmem:[#allocation2 + $0x70] sm:$0xff]  ;;  %v188_v28 = vld [vmem:[#allocation2 + $0x78] sm:$0xff] }
  0x1f   :  { %159 = vmatpush.msra.mxu1 %v137_v7  ;;  %v185_v29 = vld [vmem:[#allocation2 + $0x60] sm:$0xff]  ;;  %v186_v30 = vld [vmem:[#allocation2 + $0x68] sm:$0xff]  ;;  %v183_v35 = vld [vmem:[#allocation2 + $0x50] sm:$0xff] }
  0x20   :  { %215 = vmatpush.msra.mxu2 %v197_v17  ;;  %235 = vmatpush.msra.mxu3 %v198_v18  ;;  %v108_v31 = vld [vmem:[%s1445_s3] ss:$0 sm:$0xff]  ;;  %v184_v36 = vld [vmem:[#allocation2 + $0x58] sm:$0xff]  ;;  %v182_v38 = vld [vmem:[#allocation2 + $0x48] sm:$0xff] }
  0x21   :  { %160 = vmatpush.msra.mxu1 %v136_v8  ;;  %v181_v37 = vld [vmem:[#allocation2 + $0x40] sm:$0xff]  ;;  %v179_v39 = vld [vmem:[#allocation2 + $0x30] sm:$0xff]  ;;  %v180_v40 = vld [vmem:[#allocation2 + $0x38] sm:$0xff] }
  0x22   :  { %216 = vmatpush.msra.mxu2 %v195_v19  ;;  %236 = vmatpush.msra.mxu3 %v196_v20  ;;  %v177_v41 = vld [vmem:[#allocation2 + $0x20] sm:$0xff]  ;;  %v178_v42 = vld [vmem:[#allocation2 + $0x28] sm:$0xff]  ;;  %v175_v43 = vld [vmem:[#allocation2 + $0x10] sm:$0xff] }
  0x23   :  { %161 = vmatpush.msra.mxu1 %v135_v9  ;;  %v176_v44 = vld [vmem:[#allocation2 + $0x18] sm:$0xff]  ;;  %v173_v45 = vld [vmem:[#allocation2] sm:$0xff]  ;;  %v174_v46 = vld [vmem:[#allocation2 + $0x8] sm:$0xff] }
  0x24   :  { %217 = vmatpush.msra.mxu2 %v193_v21  ;;  %237 = vmatpush.msra.mxu3 %v194_v22  ;;  %v314_v47 = vld [vmem:[#allocation5 + $0x1e0] sm:$0xff]  ;;  %v315_v49 = vld [vmem:[#allocation5 + $0x1e8] sm:$0xff] }
  0x25   :  { %162 = vmatpush.msra.mxu1 %v134_v10  ;;  %v378_v48 = vld [vmem:[#allocation5 + $0x3e0] sm:$0xff]  ;;  %393 = vmatpush.msrb.mxu0 %v314_v47  ;;  %v379_v50 = vld [vmem:[#allocation5 + $0x3e8] sm:$0xff] }
  0x26   :  { %218 = vmatpush.msra.mxu2 %v191_v23  ;;  %238 = vmatpush.msra.mxu3 %v192_v24  ;;  %v310_v51 = vld [vmem:[#allocation5 + $0x1c0] sm:$0xff]  ;;  %v311_v53 = vld [vmem:[#allocation5 + $0x1c8] sm:$0xff] }
  0x27   :  { %413 = vmatpush.msrb.mxu1 %v378_v48  ;;  %v374_v52 = vld [vmem:[#allocation5 + $0x3c0] sm:$0xff]  ;;  %v375_v54 = vld [vmem:[#allocation5 + $0x3c8] sm:$0xff]  ;;  %394 = vmatpush.msrb.mxu0 %v310_v51 }
  0x28   :  { %219 = vmatpush.msra.mxu2 %v189_v25  ;;  %239 = vmatpush.msra.mxu3 %v190_v26  ;;  %v306_v55 = vld [vmem:[#allocation5 + $0x1a0] sm:$0xff]  ;;  %v307_v57 = vld [vmem:[#allocation5 + $0x1a8] sm:$0xff] }
  0x29   :  { %414 = vmatpush.msrb.mxu1 %v374_v52  ;;  %v370_v56 = vld [vmem:[#allocation5 + $0x3a0] sm:$0xff]  ;;  %v371_v58 = vld [vmem:[#allocation5 + $0x3a8] sm:$0xff]  ;;  %395 = vmatpush.msrb.mxu0 %v306_v55  ;;  %v316_v55 = vld [vmem:[#allocation5 + $0x1f0] sm:$0xff] }
  0x2a   :  { %220 = vmatpush.msra.mxu2 %v187_v27  ;;  %240 = vmatpush.msra.mxu3 %v188_v28  ;;  %v302_v59 = vld [vmem:[#allocation5 + $0x180] sm:$0xff]  ;;  %v303_v61 = vld [vmem:[#allocation5 + $0x188] sm:$0xff]  ;;  %v167_v28 = vlaneseq }
  0x2b   :  { %v366_v60 = vld [vmem:[#allocation5 + $0x380] sm:$0xff]  ;;  %415 = vmatpush.msrb.mxu1 %v370_v56  ;;  %v367_v62 = vld [vmem:[#allocation5 + $0x388] sm:$0xff]  ;;  %396 = vmatpush.msrb.mxu0 %v302_v59  ;;  %v380_v56 = vld [vmem:[#allocation5 + $0x3f0] sm:$0xff] }
  0x2c   :  { %221 = vmatpush.msra.mxu2 %v185_v29  ;;  %241 = vmatpush.msra.mxu3 %v186_v30  ;;  %v298_v63 = vld [vmem:[#allocation5 + $0x160] sm:$0xff]  ;;  %v299_v1 = vld [vmem:[#allocation5 + $0x168] sm:$0xff]  ;;  %v312_v59 = vld [vmem:[#allocation5 + $0x1d0] sm:$0xff] }
  0x2d   :  { %v362_v0 = vld [vmem:[#allocation5 + $0x360] sm:$0xff]  ;;  %416 = vmatpush.msrb.mxu1 %v366_v60  ;;  %v363_v2 = vld [vmem:[#allocation5 + $0x368] sm:$0xff]  ;;  %397 = vmatpush.msrb.mxu0 %v298_v63  ;;  %v376_v60 = vld [vmem:[#allocation5 + $0x3d0] sm:$0xff] }
  0x2e   :  { %222 = vmatpush.msra.mxu2 %v183_v35  ;;  %242 = vmatpush.msra.mxu3 %v184_v36  ;;  %v294_v3 = vld [vmem:[#allocation5 + $0x140] sm:$0xff]  ;;  %v295_v5 = vld [vmem:[#allocation5 + $0x148] sm:$0xff]  ;;  %v308_v63 = vld [vmem:[#allocation5 + $0x1b0] sm:$0xff] }
  0x2f   :  { %v358_v4 = vld [vmem:[#allocation5 + $0x340] sm:$0xff]  ;;  %417 = vmatpush.msrb.mxu1 %v362_v0  ;;  %v359_v6 = vld [vmem:[#allocation5 + $0x348] sm:$0xff]  ;;  %398 = vmatpush.msrb.mxu0 %v294_v3  ;;  %v372_v0 = vld [vmem:[#allocation5 + $0x3b0] sm:$0xff] }
  0x30   :  { %223 = vmatpush.msra.mxu2 %v181_v37  ;;  %243 = vmatpush.msra.mxu3 %v182_v38  ;;  %v290_v7 = vld [vmem:[#allocation5 + $0x120] sm:$0xff]  ;;  %v291_v9 = vld [vmem:[#allocation5 + $0x128] sm:$0xff]  ;;  %v304_v3 = vld [vmem:[#allocation5 + $0x190] sm:$0xff] }
  0x31   :  { %v354_v8 = vld [vmem:[#allocation5 + $0x320] sm:$0xff]  ;;  %418 = vmatpush.msrb.mxu1 %v358_v4  ;;  %v355_v10 = vld [vmem:[#allocation5 + $0x328] sm:$0xff]  ;;  %399 = vmatpush.msrb.mxu0 %v290_v7  ;;  %v368_v4 = vld [vmem:[#allocation5 + $0x390] sm:$0xff] }
  0x32   :  { %224 = vmatpush.msra.mxu2 %v179_v39  ;;  %244 = vmatpush.msra.mxu3 %v180_v40  ;;  %v286_v11 = vld [vmem:[#allocation5 + $0x100] sm:$0xff]  ;;  %v287_v13 = vld [vmem:[#allocation5 + $0x108] sm:$0xff]  ;;  %v1336_v39 = vand.u32 127, %v167_v28  ;;  %v300_v7 = vld [vmem:[#allocation5 + $0x170] sm:$0xff] }
  0x33   :  { %v350_v12 = vld [vmem:[#allocation5 + $0x300] sm:$0xff]  ;;  %419 = vmatpush.msrb.mxu1 %v354_v8  ;;  %v351_v14 = vld [vmem:[#allocation5 + $0x308] sm:$0xff]  ;;  %400 = vmatpush.msrb.mxu0 %v286_v11  ;;  %v364_v8 = vld [vmem:[#allocation5 + $0x370] sm:$0xff] }
  0x34   :  { %225 = vmatpush.msra.mxu2 %v177_v41  ;;  %245 = vmatpush.msra.mxu3 %v178_v42  ;;  %v282_v15 = vld [vmem:[#allocation5 + $0xe0] sm:$0xff]  ;;  %v283_v17 = vld [vmem:[#allocation5 + $0xe8] sm:$0xff]  ;;  %vm169_vm2 = vcmp.lt.s32.totalorder %v1336_v39, 64  ;;  %v296_v11 = vld [vmem:[#allocation5 + $0x150] sm:$0xff]  ;;  %vm998_vm3 = vcmp.lt.s32.totalorder %v1336_v39, 4  ;;  %vm1014_vm5 = vcmp.eq.s32.totalorder %v1336_v39, 1 }
  0x35   :  { %v346_v16 = vld [vmem:[#allocation5 + $0x2e0] sm:$0xff]  ;;  %420 = vmatpush.msrb.mxu1 %v350_v12  ;;  %v347_v18 = vld [vmem:[#allocation5 + $0x2e8] sm:$0xff]  ;;  %401 = vmatpush.msrb.mxu0 %v282_v15  ;;  %v360_v12 = vld [vmem:[#allocation5 + $0x350] sm:$0xff]  ;;  %vm1013_vm6 = vcmp.eq.s32.totalorder %v1336_v39, 0 }
  0x36   :  { %226 = vmatpush.msra.mxu2 %v175_v43  ;;  %246 = vmatpush.msra.mxu3 %v176_v44  ;;  %v278_v19 = vld [vmem:[#allocation5 + $0xc0] sm:$0xff]  ;;  %v279_v21 = vld [vmem:[#allocation5 + $0xc8] sm:$0xff]  ;;  %v292_v15 = vld [vmem:[#allocation5 + $0x130] sm:$0xff] }
  0x37   :  { %v342_v20 = vld [vmem:[#allocation5 + $0x2c0] sm:$0xff]  ;;  %421 = vmatpush.msrb.mxu1 %v346_v16  ;;  %v343_v22 = vld [vmem:[#allocation5 + $0x2c8] sm:$0xff]  ;;  %402 = vmatpush.msrb.mxu0 %v278_v19  ;;  %v356_v16 = vld [vmem:[#allocation5 + $0x330] sm:$0xff] }
  0x38   :  { %227 = vmatpush.msra.mxu2 %v173_v45  ;;  %247 = vmatpush.msra.mxu3 %v174_v46  ;;  %v274_v23 = vld [vmem:[#allocation5 + $0xa0] sm:$0xff]  ;;  %v275_v26 = vld [vmem:[#allocation5 + $0xa8] sm:$0xff]  ;;  %v288_v19 = vld [vmem:[#allocation5 + $0x110] sm:$0xff] }
  0x39   :  { %v338_v24 = vld [vmem:[#allocation5 + $0x2a0] sm:$0xff]  ;;  %422 = vmatpush.msrb.mxu1 %v342_v20  ;;  %v339_v27 = vld [vmem:[#allocation5 + $0x2a8] sm:$0xff]  ;;  %403 = vmatpush.msrb.mxu0 %v274_v23  ;;  %v352_v20 = vld [vmem:[#allocation5 + $0x310] sm:$0xff] }
  0x3a   :  { %433 = vmatpush.msrb.mxu2 %v315_v49  ;;  %453 = vmatpush.msrb.mxu3 %v379_v50  ;;  %v142_v25 = vld [vmem:[%s1445_s3 + $0x1] ss:$0 sm:$0xff]  ;;  %v267_v37 = vld [vmem:[#allocation5 + $0x68] sm:$0xff]  ;;  %v284_v23 = vld [vmem:[#allocation5 + $0xf0] sm:$0xff] }
  0x3b   :  { %v270_v29 = vld [vmem:[#allocation5 + $0x80] sm:$0xff]  ;;  %423 = vmatpush.msrb.mxu1 %v338_v24  ;;  %v331_v38 = vld [vmem:[#allocation5 + $0x268] sm:$0xff]  ;;  %v348_v24 = vld [vmem:[#allocation5 + $0x2f0] sm:$0xff] }
  0x3c   :  { %434 = vmatpush.msrb.mxu2 %v311_v53  ;;  %454 = vmatpush.msrb.mxu3 %v375_v54  ;;  %v334_v30 = vld [vmem:[#allocation5 + $0x280] sm:$0xff]  ;;  %v263_v42 = vld [vmem:[#allocation5 + $0x48] sm:$0xff]  ;;  %v344_v28 = vld [vmem:[#allocation5 + $0x2d0] sm:$0xff] }
  0x3d   :  { %v266_v35 = vld [vmem:[#allocation5 + $0x60] sm:$0xff]  ;;  %404 = vmatpush.msrb.mxu0 %v270_v29  ;;  %424 = vmatpush.msrb.mxu1 %v334_v30  ;;  %v327_v43 = vld [vmem:[#allocation5 + $0x248] sm:$0xff]  ;;  %v281_v29 = vld [vmem:[#allocation5 + $0xd8] sm:$0xff] }
  0x3e   :  { %435 = vmatpush.msrb.mxu2 %v307_v57  ;;  %455 = vmatpush.msrb.mxu3 %v371_v58  ;;  %v330_v36 = vld [vmem:[#allocation5 + $0x260] sm:$0xff]  ;;  %v259_v46 = vld [vmem:[#allocation5 + $0x28] sm:$0xff]  ;;  %v317_v57 = vld [vmem:[#allocation5 + $0x1f8] sm:$0xff] }
  0x3f   :  { %v262_v40 = vld [vmem:[#allocation5 + $0x40] sm:$0xff]  ;;  %405 = vmatpush.msrb.mxu0 %v266_v35  ;;  %425 = vmatpush.msrb.mxu1 %v330_v36  ;;  %v323_v47 = vld [vmem:[#allocation5 + $0x228] sm:$0xff]  ;;  %v381_v58 = vld [vmem:[#allocation5 + $0x3f8] sm:$0xff] }
  0x40   :  { %436 = vmatpush.msrb.mxu2 %v303_v61  ;;  %456 = vmatpush.msrb.mxu3 %v367_v62  ;;  %v326_v41 = vld [vmem:[#allocation5 + $0x240] sm:$0xff]  ;;  %v255_v52 = vld [vmem:[#allocation5 + $0x8] sm:$0xff]  ;;  %v313_v61 = vld [vmem:[#allocation5 + $0x1d8] sm:$0xff] }
  0x41   :  { %v258_v44 = vld [vmem:[#allocation5 + $0x20] sm:$0xff]  ;;  %406 = vmatpush.msrb.mxu0 %v262_v40  ;;  %426 = vmatpush.msrb.mxu1 %v326_v41  ;;  %v319_v53 = vld [vmem:[#allocation5 + $0x208] sm:$0xff]  ;;  %v377_v62 = vld [vmem:[#allocation5 + $0x3d8] sm:$0xff] }
  0x42   :  { %437 = vmatpush.msrb.mxu2 %v299_v1  ;;  %457 = vmatpush.msrb.mxu3 %v363_v2  ;;  %v322_v45 = vld [vmem:[#allocation5 + $0x220] sm:$0xff]  ;;  %v309_v1 = vld [vmem:[#allocation5 + $0x1b8] sm:$0xff]  ;;  %v272_v35 = vld [vmem:[#allocation5 + $0x90] sm:$0xff] }
  0x43   :  { %v254_v48 = vld [vmem:[#allocation5] sm:$0xff]  ;;  %407 = vmatpush.msrb.mxu0 %v258_v44  ;;  %427 = vmatpush.msrb.mxu1 %v322_v45  ;;  %v373_v2 = vld [vmem:[#allocation5 + $0x3b8] sm:$0xff]  ;;  %v336_v36 = vld [vmem:[#allocation5 + $0x290] sm:$0xff] }
  0x44   :  { %438 = vmatpush.msrb.mxu2 %v295_v5  ;;  %458 = vmatpush.msrb.mxu3 %v359_v6  ;;  %v318_v49 = vld [vmem:[#allocation5 + $0x200] sm:$0xff]  ;;  %v305_v5 = vld [vmem:[#allocation5 + $0x198] sm:$0xff]  ;;  %v268_v40 = vld [vmem:[#allocation5 + $0x70] sm:$0xff] }
  0x45   :  { %408 = vmatpush.msrb.mxu0 %v254_v48  ;;  %428 = vmatpush.msrb.mxu1 %v318_v49  ;;  %v369_v6 = vld [vmem:[#allocation5 + $0x398] sm:$0xff]  ;;  %v332_v41 = vld [vmem:[#allocation5 + $0x270] sm:$0xff] }
  0x46   :  { %439 = vmatpush.msrb.mxu2 %v291_v9  ;;  %459 = vmatpush.msrb.mxu3 %v355_v10  ;;  %v301_v9 = vld [vmem:[#allocation5 + $0x178] sm:$0xff]  ;;  %v264_v44 = vld [vmem:[#allocation5 + $0x50] sm:$0xff] }
  0x47   :  { %473 = vmatpush.msra.mxu0 %v316_v55  ;;  %v365_v10 = vld [vmem:[#allocation5 + $0x378] sm:$0xff]  ;;  %v328_v45 = vld [vmem:[#allocation5 + $0x250] sm:$0xff] }
  0x48   :  { %440 = vmatpush.msrb.mxu2 %v287_v13  ;;  %460 = vmatpush.msrb.mxu3 %v351_v14  ;;  %v297_v13 = vld [vmem:[#allocation5 + $0x158] sm:$0xff]  ;;  %v260_v48 = vld [vmem:[#allocation5 + $0x30] sm:$0xff] }
  0x49   :  { %474 = vmatpush.msra.mxu0 %v312_v59  ;;  %v361_v14 = vld [vmem:[#allocation5 + $0x358] sm:$0xff]  ;;  %v324_v49 = vld [vmem:[#allocation5 + $0x230] sm:$0xff] }
  0x4a   :  { %441 = vmatpush.msrb.mxu2 %v283_v17  ;;  %461 = vmatpush.msrb.mxu3 %v347_v18  ;;  %v293_v17 = vld [vmem:[#allocation5 + $0x138] sm:$0xff] }
  0x4b   :  { %475 = vmatpush.msra.mxu0 %v308_v63  ;;  %v357_v18 = vld [vmem:[#allocation5 + $0x338] sm:$0xff] }
  0x4c   :  { %442 = vmatpush.msrb.mxu2 %v279_v21  ;;  %462 = vmatpush.msrb.mxu3 %v343_v22  ;;  %v289_v21 = vld [vmem:[#allocation5 + $0x118] sm:$0xff] }
  0x4d   :  { %476 = vmatpush.msra.mxu0 %v304_v3  ;;  %v353_v22 = vld [vmem:[#allocation5 + $0x318] sm:$0xff]  ;;  %v651_v3 = vld [vmem:[#allocation7 + $0x2f0] sm:$0xff] }
  0x4e   :  { %443 = vmatpush.msrb.mxu2 %v275_v26  ;;  %463 = vmatpush.msrb.mxu3 %v339_v27  ;;  %v349_v26 = vld [vmem:[#allocation5 + $0x2f8] sm:$0xff]  ;;  %v280_v27 = vld [vmem:[#allocation5 + $0xd0] sm:$0xff] }
  0x4f   :  { %477 = vmatpush.msra.mxu0 %v300_v7  ;;  %v345_v30 = vld [vmem:[#allocation5 + $0x2d8] sm:$0xff]  ;;  %v649_v7 = vld [vmem:[#allocation7 + $0x2e0] sm:$0xff] }
  0x50   :  { %v321_v55 = vld [vmem:[#allocation5 + $0x218] sm:$0xff] }
  0x51   :  { %478 = vmatpush.msra.mxu0 %v296_v11  ;;  %v647_v11 = vld [vmem:[#allocation7 + $0x2d0] sm:$0xff] }
  0x53   :  { %479 = vmatpush.msra.mxu0 %v292_v15  ;;  %v645_v15 = vld [vmem:[#allocation7 + $0x2c0] sm:$0xff] }
  0x55   :  { %480 = vmatpush.msra.mxu0 %v288_v19  ;;  %v643_v19 = vld [vmem:[#allocation7 + $0x2b0] sm:$0xff] }
  0x57   :  { %481 = vmatpush.msra.mxu0 %v284_v23  ;;  %v641_v23 = vld [vmem:[#allocation7 + $0x2a0] sm:$0xff] }
  0x59   :  { %482 = vmatpush.msra.mxu0 %v280_v27  ;;  %v639_v27 = vld [vmem:[#allocation7 + $0x290] sm:$0xff] }
  0x96   :  { %v130_v32 = vpop.f32.mrf.mxu0 }
  0x97   :  { %v131_v33 = vadd.f32 %v130_v32, %v108_v31  ;;  %v271_v32 = vld [vmem:[#allocation5 + $0x88] sm:$0xff] }
  0x98   :  { %444 = vmatpush.msrb.mxu2 %v271_v32  ;;  %v340_v32 = vld [vmem:[#allocation5 + $0x2b0] sm:$0xff] }
  0x99   :  { %1063 = vtanh.f32 %v131_v33  ;;  %v335_v33 = vld [vmem:[#allocation5 + $0x288] sm:$0xff] }
  0x9a   :  { %464 = vmatpush.msrb.mxu3 %v335_v33  ;;  %445 = vmatpush.msrb.mxu2 %v267_v37  ;;  %v277_v33 = vld [vmem:[#allocation5 + $0xb8] sm:$0xff] }
  0x9b   :  { %v273_v37 = vld [vmem:[#allocation5 + $0x98] sm:$0xff] }
  0x9c   :  { %465 = vmatpush.msrb.mxu3 %v331_v38  ;;  %446 = vmatpush.msrb.mxu2 %v263_v42  ;;  %v337_v38 = vld [vmem:[#allocation5 + $0x298] sm:$0xff] }
  0x9d   :  { %v269_v42 = vld [vmem:[#allocation5 + $0x78] sm:$0xff] }
  0x9e   :  { %466 = vmatpush.msrb.mxu3 %v327_v43  ;;  %447 = vmatpush.msrb.mxu2 %v259_v46  ;;  %v333_v43 = vld [vmem:[#allocation5 + $0x278] sm:$0xff] }
  0x9f   :  { %v1064_v34 = vpop.eup %1063  ;;  %v265_v46 = vld [vmem:[#allocation5 + $0x58] sm:$0xff] }
  0xa0   :  { %1044 = vmatmul.msk.f32.vlgmr.msra.gmra.mxu1 %vm143_vm1, %v1064_v34  ;;  %467 = vmatpush.msrb.mxu3 %v323_v47  ;;  %v329_v47 = vld [vmem:[#allocation5 + $0x258] sm:$0xff] }
  0xa1   :  { %448 = vmatpush.msrb.mxu2 %v255_v52  ;;  %493 = vmatpush.msra.mxu1 %v380_v56  ;;  %v256_v52 = vld [vmem:[#allocation5 + $0x10] sm:$0xff]  ;;  %v1045_v56 = vld [vmem:[%s1445_s3 + $0x2] ss:$8 sm:$0x3] }
  0xa2   :  { %468 = vmatpush.msrb.mxu3 %v319_v53  ;;  %v320_v53 = vld [vmem:[#allocation5 + $0x210] sm:$0xff] }
  0xa3   :  { %494 = vmatpush.msra.mxu1 %v376_v60 }
  0xa5   :  { %495 = vmatpush.msra.mxu1 %v372_v0 }
  0xa7   :  { %496 = vmatpush.msra.mxu1 %v368_v4  ;;  %v683_v4 = vld [vmem:[#allocation7 + $0x3f0] sm:$0xff] }
  0xa9   :  { %497 = vmatpush.msra.mxu1 %v364_v8  ;;  %v681_v8 = vld [vmem:[#allocation7 + $0x3e0] sm:$0xff] }
  0xab   :  { %498 = vmatpush.msra.mxu1 %v360_v12  ;;  %v679_v12 = vld [vmem:[#allocation7 + $0x3d0] sm:$0xff] }
  0xad   :  { %499 = vmatpush.msra.mxu1 %v356_v16  ;;  %v677_v16 = vld [vmem:[#allocation7 + $0x3c0] sm:$0xff] }
  0xaf   :  { %500 = vmatpush.msra.mxu1 %v352_v20  ;;  %v675_v20 = vld [vmem:[#allocation7 + $0x3b0] sm:$0xff] }
  0xb1   :  { %501 = vmatpush.msra.mxu1 %v348_v24  ;;  %v673_v24 = vld [vmem:[#allocation7 + $0x3a0] sm:$0xff] }
  0xb3   :  { %502 = vmatpush.msra.mxu1 %v344_v28  ;;  %v671_v28 = vld [vmem:[#allocation7 + $0x390] sm:$0xff] }
  0xb5   :  { %503 = vmatpush.msra.mxu1 %v340_v32  ;;  %v669_v32 = vld [vmem:[#allocation7 + $0x380] sm:$0xff] }
  0xb7   :  { %504 = vmatpush.msra.mxu1 %v336_v36  ;;  %v667_v36 = vld [vmem:[#allocation7 + $0x370] sm:$0xff] }
  0xb9   :  { %505 = vmatpush.msra.mxu1 %v332_v41  ;;  %v665_v41 = vld [vmem:[#allocation7 + $0x360] sm:$0xff] }
  0xbb   :  { %506 = vmatpush.msra.mxu1 %v328_v45  ;;  %v663_v45 = vld [vmem:[#allocation7 + $0x350] sm:$0xff] }
  0xbd   :  { %507 = vmatpush.msra.mxu1 %v324_v49  ;;  %v661_v49 = vld [vmem:[#allocation7 + $0x340] sm:$0xff] }
  0xbf   :  { %508 = vmatpush.msra.mxu1 %v320_v53  ;;  %v659_v53 = vld [vmem:[#allocation7 + $0x330] sm:$0xff] }
 0x11d   :  { %v164_v31 = vpop.f32.mrf.mxu1 }
 0x11e   :  { %v165_v34 = vadd.f32 %v164_v31, %v142_v25  ;;  %v285_v25 = vld [vmem:[#allocation5 + $0xf8] sm:$0xff]  ;;  %v276_v31 = vld [vmem:[#allocation5 + $0xb0] sm:$0xff] }
 0x11f   :  { %483 = vmatpush.msra.mxu0 %v276_v31  ;;  %v637_v31 = vld [vmem:[#allocation7 + $0x280] sm:$0xff] }
 0x120   :  { %1065 = vtanh.f32 %v165_v34  ;;  %v171_v50 = vmax.f32 %v165_v34, 0.0  ;;  %v341_v34 = vld [vmem:[#allocation5 + $0x2b8] sm:$0xff] }
 0x121   :  { %484 = vmatpush.msra.mxu0 %v272_v35  ;;  %v635_v35 = vld [vmem:[#allocation7 + $0x270] sm:$0xff] }
 0x123   :  { %485 = vmatpush.msra.mxu0 %v268_v40  ;;  %v633_v40 = vld [vmem:[#allocation7 + $0x260] sm:$0xff] }
 0x125   :  { %486 = vmatpush.msra.mxu0 %v264_v44  ;;  %v631_v44 = vld [vmem:[#allocation7 + $0x250] sm:$0xff] }
 0x126   :  { %v1066_v51 = vpop.eup %1065 }
 0x127   :  { %v172_v54 = vsel %vm169_vm2, %v1066_v51, %v171_v50  ;;  %v261_v50 = vld [vmem:[#allocation5 + $0x38] sm:$0xff]  ;;  %487 = vmatpush.msra.mxu0 %v260_v48  ;;  %v629_v48 = vld [vmem:[#allocation7 + $0x240] sm:$0xff] }
 0x128   :  { %228 = vmatmul.f32.vlgmr.msra.gmra.mxu2 %v172_v54  ;;  %248 = vmatmul.f32.vlgmr.msra.gmra.mxu3 %v172_v54  ;;  %v325_v51 = vld [vmem:[#allocation5 + $0x238] sm:$0xff] }
 0x129   :  { %513 = vmatpush.msra.mxu2 %v317_v57  ;;  %533 = vmatpush.msra.mxu3 %v381_v58  ;;  %v257_v54 = vld [vmem:[#allocation5 + $0x18] sm:$0xff]  ;;  %v208_v57 = vperm.slane %v1045_v56, 0  ;;  %v209_v58 = vperm.slane %v1045_v56, 1  ;;  %v625_v56 = vld [vmem:[#allocation7 + $0x220] sm:$0xff] }
 0x12a   :  { %488 = vmatpush.msra.mxu0 %v256_v52  ;;  %v627_v52 = vld [vmem:[#allocation7 + $0x230] sm:$0xff] }
 0x12b   :  { %514 = vmatpush.msra.mxu2 %v313_v61  ;;  %534 = vmatpush.msra.mxu3 %v377_v62 }
 0x12d   :  { %515 = vmatpush.msra.mxu2 %v309_v1  ;;  %535 = vmatpush.msra.mxu3 %v373_v2  ;;  %v587_v1 = vld [vmem:[#allocation7 + $0xf0] sm:$0xff] }
 0x12e   :  { %v619_v2 = vld [vmem:[#allocation7 + $0x1f0] sm:$0xff] }
 0x12f   :  { %516 = vmatpush.msra.mxu2 %v305_v5  ;;  %536 = vmatpush.msra.mxu3 %v369_v6  ;;  %v585_v5 = vld [vmem:[#allocation7 + $0xe0] sm:$0xff] }
 0x130   :  { %v617_v6 = vld [vmem:[#allocation7 + $0x1e0] sm:$0xff] }
 0x131   :  { %517 = vmatpush.msra.mxu2 %v301_v9  ;;  %537 = vmatpush.msra.mxu3 %v365_v10  ;;  %v583_v9 = vld [vmem:[#allocation7 + $0xd0] sm:$0xff] }
 0x132   :  { %v615_v10 = vld [vmem:[#allocation7 + $0x1d0] sm:$0xff] }
 0x133   :  { %518 = vmatpush.msra.mxu2 %v297_v13  ;;  %538 = vmatpush.msra.mxu3 %v361_v14  ;;  %v581_v13 = vld [vmem:[#allocation7 + $0xc0] sm:$0xff] }
 0x134   :  { %v613_v14 = vld [vmem:[#allocation7 + $0x1c0] sm:$0xff] }
 0x135   :  { %519 = vmatpush.msra.mxu2 %v293_v17  ;;  %539 = vmatpush.msra.mxu3 %v357_v18  ;;  %v579_v17 = vld [vmem:[#allocation7 + $0xb0] sm:$0xff] }
 0x136   :  { %v611_v18 = vld [vmem:[#allocation7 + $0x1b0] sm:$0xff] }
 0x137   :  { %520 = vmatpush.msra.mxu2 %v289_v21  ;;  %540 = vmatpush.msra.mxu3 %v353_v22  ;;  %v577_v21 = vld [vmem:[#allocation7 + $0xa0] sm:$0xff] }
 0x138   :  { %v609_v22 = vld [vmem:[#allocation7 + $0x1a0] sm:$0xff] }
 0x139   :  { %521 = vmatpush.msra.mxu2 %v285_v25  ;;  %541 = vmatpush.msra.mxu3 %v349_v26  ;;  %v575_v25 = vld [vmem:[#allocation7 + $0x90] sm:$0xff] }
 0x13a   :  { %v607_v26 = vld [vmem:[#allocation7 + $0x190] sm:$0xff] }
 0x13b   :  { %522 = vmatpush.msra.mxu2 %v281_v29  ;;  %542 = vmatpush.msra.mxu3 %v345_v30  ;;  %v573_v29 = vld [vmem:[#allocation7 + $0x80] sm:$0xff] }
 0x13c   :  { %v605_v30 = vld [vmem:[#allocation7 + $0x180] sm:$0xff] }
 0x13d   :  { %523 = vmatpush.msra.mxu2 %v277_v33  ;;  %543 = vmatpush.msra.mxu3 %v341_v34  ;;  %v571_v33 = vld [vmem:[#allocation7 + $0x70] sm:$0xff] }
 0x13e   :  { %v603_v34 = vld [vmem:[#allocation7 + $0x170] sm:$0xff] }
 0x13f   :  { %524 = vmatpush.msra.mxu2 %v273_v37  ;;  %544 = vmatpush.msra.mxu3 %v337_v38  ;;  %v569_v37 = vld [vmem:[#allocation7 + $0x60] sm:$0xff] }
 0x140   :  { %v601_v38 = vld [vmem:[#allocation7 + $0x160] sm:$0xff] }
 0x141   :  { %525 = vmatpush.msra.mxu2 %v269_v42  ;;  %545 = vmatpush.msra.mxu3 %v333_v43  ;;  %v567_v42 = vld [vmem:[#allocation7 + $0x50] sm:$0xff] }
 0x142   :  { %v599_v43 = vld [vmem:[#allocation7 + $0x150] sm:$0xff] }
 0x143   :  { %526 = vmatpush.msra.mxu2 %v265_v46  ;;  %546 = vmatpush.msra.mxu3 %v329_v47  ;;  %v565_v46 = vld [vmem:[#allocation7 + $0x40] sm:$0xff] }
 0x144   :  { %v597_v47 = vld [vmem:[#allocation7 + $0x140] sm:$0xff] }
 0x145   :  { %527 = vmatpush.msra.mxu2 %v261_v50  ;;  %547 = vmatpush.msra.mxu3 %v325_v51  ;;  %v563_v50 = vld [vmem:[#allocation7 + $0x30] sm:$0xff] }
 0x146   :  { %v595_v51 = vld [vmem:[#allocation7 + $0x130] sm:$0xff] }
 0x147   :  { %528 = vmatpush.msra.mxu2 %v257_v54  ;;  %548 = vmatpush.msra.mxu3 %v321_v55  ;;  %v561_v54 = vld [vmem:[#allocation7 + $0x20] sm:$0xff] }
 0x148   :  { %v593_v55 = vld [vmem:[#allocation7 + $0x120] sm:$0xff] }
 0x1ab   :  { %v229_v59 = vpop.f32.mrf.mxu2  ;;  %v249_v60 = vpop.f32.mrf.mxu3 }
 0x1ac   :  { %v230_v61 = vadd.f32 %v229_v59, %v208_v57  ;;  %v250_v62 = vadd.f32 %v249_v60, %v209_v58  ;;  %v657_v57 = vld [vmem:[#allocation7 + $0x320] sm:$0xff]  ;;  %v559_v58 = vld [vmem:[#allocation7 + $0x10] sm:$0xff] }
 0x1ad   :  { %v591_v59 = vld [vmem:[#allocation7 + $0x110] sm:$0xff] }
 0x1ae   :  { %v252_v63 = vmax.f32 %v230_v61, 0.0  ;;  %v253_v0 = vmax.f32 %v250_v62, 0.0  ;;  %v623_v60 = vld [vmem:[#allocation7 + $0x210] sm:$0xff]  ;;  %v557_v61 = vld [vmem:[#allocation7] sm:$0xff] }
 0x1af   :  { %v589_v62 = vld [vmem:[#allocation7 + $0x100] sm:$0xff] }
 0x1b0   :  { %409 = vmatmul.f32.vlgmr.msrb.gmra.mxu0 %v252_v63  ;;  %429 = vmatmul.f32.vlgmr.msrb.gmra.mxu1 %v253_v0 }
 0x1b1   :  { %449 = vmatmul.f32.vlgmr.msrb.gmra.mxu2 %v252_v63  ;;  %469 = vmatmul.f32.vlgmr.msrb.gmra.mxu3 %v253_v0 }
 0x1b2   :  { %692 = vmatpush.msrb.mxu0 %v587_v1  ;;  %712 = vmatpush.msrb.mxu1 %v619_v2  ;;  %v621_v1 = vld [vmem:[#allocation7 + $0x200] sm:$0xff]  ;;  %v586_v2 = vld [vmem:[#allocation7 + $0xe8] sm:$0xff] }
 0x1b3   :  { %732 = vmatpush.msrb.mxu2 %v651_v3  ;;  %752 = vmatpush.msrb.mxu3 %v683_v4  ;;  %v618_v3 = vld [vmem:[#allocation7 + $0x1e8] sm:$0xff]  ;;  %v652_v4 = vld [vmem:[#allocation7 + $0x2f8] sm:$0xff] }
 0x1b4   :  { %693 = vmatpush.msrb.mxu0 %v585_v5  ;;  %713 = vmatpush.msrb.mxu1 %v617_v6  ;;  %v584_v5 = vld [vmem:[#allocation7 + $0xd8] sm:$0xff] }
 0x1b5   :  { %733 = vmatpush.msrb.mxu2 %v649_v7  ;;  %753 = vmatpush.msrb.mxu3 %v681_v8  ;;  %v616_v6 = vld [vmem:[#allocation7 + $0x1d8] sm:$0xff]  ;;  %v650_v7 = vld [vmem:[#allocation7 + $0x2e8] sm:$0xff] }
 0x1b6   :  { %694 = vmatpush.msrb.mxu0 %v583_v9  ;;  %714 = vmatpush.msrb.mxu1 %v615_v10  ;;  %v582_v8 = vld [vmem:[#allocation7 + $0xc8] sm:$0xff]  ;;  %v580_v9 = vld [vmem:[#allocation7 + $0xb8] sm:$0xff] }
 0x1b7   :  { %734 = vmatpush.msrb.mxu2 %v647_v11  ;;  %754 = vmatpush.msrb.mxu3 %v679_v12  ;;  %v578_v10 = vld [vmem:[#allocation7 + $0xa8] sm:$0xff]  ;;  %v655_v11 = vld [vmem:[#allocation7 + $0x310] sm:$0xff]  ;;  %v576_v12 = vld [vmem:[#allocation7 + $0x98] sm:$0xff] }
 0x1b8   :  { %489 = vmatmul.f32.vlgmr.msra.gmra.mxu0 %v252_v63  ;;  %509 = vmatmul.f32.vlgmr.msra.gmra.mxu1 %v253_v0 }
 0x1b9   :  { %529 = vmatmul.f32.vlgmr.msra.gmra.mxu2 %v252_v63  ;;  %549 = vmatmul.f32.vlgmr.msra.gmra.mxu3 %v253_v0  ;;  %v588_v63 = vld [vmem:[#allocation7 + $0xf8] sm:$0xff] }
 0x1ba   :  { %695 = vmatpush.msrb.mxu0 %v581_v13  ;;  %715 = vmatpush.msrb.mxu1 %v613_v14  ;;  %v620_v0 = vld [vmem:[#allocation7 + $0x1f8] sm:$0xff]  ;;  %v614_v13 = vld [vmem:[#allocation7 + $0x1c8] sm:$0xff] }
 0x1bb   :  { %735 = vmatpush.msrb.mxu2 %v645_v15  ;;  %755 = vmatpush.msrb.mxu3 %v677_v16  ;;  %v648_v14 = vld [vmem:[#allocation7 + $0x2d8] sm:$0xff]  ;;  %v653_v15 = vld [vmem:[#allocation7 + $0x300] sm:$0xff]  ;;  %v574_v16 = vld [vmem:[#allocation7 + $0x88] sm:$0xff] }
 0x1bc   :  { %696 = vmatpush.msrb.mxu0 %v579_v17  ;;  %716 = vmatpush.msrb.mxu1 %v611_v18  ;;  %v612_v17 = vld [vmem:[#allocation7 + $0x1b8] sm:$0xff]  ;;  %v646_v18 = vld [vmem:[#allocation7 + $0x2c8] sm:$0xff] }
 0x1bd   :  { %736 = vmatpush.msrb.mxu2 %v643_v19  ;;  %756 = vmatpush.msrb.mxu3 %v675_v20  ;;  %v684_v19 = vld [vmem:[#allocation7 + $0x3f8] sm:$0xff] }
 0x1be   :  { %697 = vmatpush.msrb.mxu0 %v577_v21  ;;  %717 = vmatpush.msrb.mxu1 %v609_v22  ;;  %v572_v20 = vld [vmem:[#allocation7 + $0x78] sm:$0xff]  ;;  %v610_v21 = vld [vmem:[#allocation7 + $0x1a8] sm:$0xff] }
 0x1bf   :  { %737 = vmatpush.msrb.mxu2 %v641_v23  ;;  %757 = vmatpush.msrb.mxu3 %v673_v24  ;;  %v644_v22 = vld [vmem:[#allocation7 + $0x2b8] sm:$0xff]  ;;  %v682_v23 = vld [vmem:[#allocation7 + $0x3e8] sm:$0xff] }
 0x1c0   :  { %698 = vmatpush.msrb.mxu0 %v575_v25  ;;  %718 = vmatpush.msrb.mxu1 %v607_v26  ;;  %v570_v24 = vld [vmem:[#allocation7 + $0x68] sm:$0xff]  ;;  %v608_v25 = vld [vmem:[#allocation7 + $0x198] sm:$0xff] }
 0x1c1   :  { %738 = vmatpush.msrb.mxu2 %v639_v27  ;;  %758 = vmatpush.msrb.mxu3 %v671_v28  ;;  %v642_v26 = vld [vmem:[#allocation7 + $0x2a8] sm:$0xff]  ;;  %v680_v27 = vld [vmem:[#allocation7 + $0x3d8] sm:$0xff] }
 0x1c2   :  { %699 = vmatpush.msrb.mxu0 %v573_v29  ;;  %719 = vmatpush.msrb.mxu1 %v605_v30  ;;  %v568_v28 = vld [vmem:[#allocation7 + $0x58] sm:$0xff]  ;;  %v606_v29 = vld [vmem:[#allocation7 + $0x188] sm:$0xff] }
 0x1c3   :  { %739 = vmatpush.msrb.mxu2 %v637_v31  ;;  %759 = vmatpush.msrb.mxu3 %v669_v32  ;;  %v640_v30 = vld [vmem:[#allocation7 + $0x298] sm:$0xff]  ;;  %v678_v31 = vld [vmem:[#allocation7 + $0x3c8] sm:$0xff] }
 0x1c4   :  { %700 = vmatpush.msrb.mxu0 %v571_v33  ;;  %720 = vmatpush.msrb.mxu1 %v603_v34  ;;  %v566_v32 = vld [vmem:[#allocation7 + $0x48] sm:$0xff]  ;;  %v604_v33 = vld [vmem:[#allocation7 + $0x178] sm:$0xff] }
 0x1c5   :  { %740 = vmatpush.msrb.mxu2 %v635_v35  ;;  %760 = vmatpush.msrb.mxu3 %v667_v36  ;;  %v638_v34 = vld [vmem:[#allocation7 + $0x288] sm:$0xff]  ;;  %v676_v35 = vld [vmem:[#allocation7 + $0x3b8] sm:$0xff] }
 0x1c6   :  { %701 = vmatpush.msrb.mxu0 %v569_v37  ;;  %721 = vmatpush.msrb.mxu1 %v601_v38  ;;  %v564_v36 = vld [vmem:[#allocation7 + $0x38] sm:$0xff]  ;;  %v602_v37 = vld [vmem:[#allocation7 + $0x168] sm:$0xff] }
 0x1c7   :  { %741 = vmatpush.msrb.mxu2 %v633_v40  ;;  %761 = vmatpush.msrb.mxu3 %v665_v41  ;;  %v636_v38 = vld [vmem:[#allocation7 + $0x278] sm:$0xff]  ;;  %v674_v40 = vld [vmem:[#allocation7 + $0x3a8] sm:$0xff] }
 0x1c8   :  { %702 = vmatpush.msrb.mxu0 %v567_v42  ;;  %722 = vmatpush.msrb.mxu1 %v599_v43  ;;  %v562_v41 = vld [vmem:[#allocation7 + $0x28] sm:$0xff]  ;;  %v600_v42 = vld [vmem:[#allocation7 + $0x158] sm:$0xff] }
 0x1c9   :  { %742 = vmatpush.msrb.mxu2 %v631_v44  ;;  %762 = vmatpush.msrb.mxu3 %v663_v45  ;;  %v634_v43 = vld [vmem:[#allocation7 + $0x268] sm:$0xff]  ;;  %v672_v44 = vld [vmem:[#allocation7 + $0x398] sm:$0xff] }
 0x1ca   :  { %703 = vmatpush.msrb.mxu0 %v565_v46  ;;  %723 = vmatpush.msrb.mxu1 %v597_v47  ;;  %v560_v45 = vld [vmem:[#allocation7 + $0x18] sm:$0xff]  ;;  %v598_v46 = vld [vmem:[#allocation7 + $0x148] sm:$0xff] }
 0x1cb   :  { %743 = vmatpush.msrb.mxu2 %v629_v48  ;;  %763 = vmatpush.msrb.mxu3 %v661_v49  ;;  %v632_v47 = vld [vmem:[#allocation7 + $0x258] sm:$0xff]  ;;  %v670_v48 = vld [vmem:[#allocation7 + $0x388] sm:$0xff] }
 0x1cc   :  { %704 = vmatpush.msrb.mxu0 %v563_v50  ;;  %724 = vmatpush.msrb.mxu1 %v595_v51  ;;  %v558_v49 = vld [vmem:[#allocation7 + $0x8] sm:$0xff]  ;;  %v596_v50 = vld [vmem:[#allocation7 + $0x138] sm:$0xff] }
 0x1cd   :  { %744 = vmatpush.msrb.mxu2 %v627_v52  ;;  %764 = vmatpush.msrb.mxu3 %v659_v53  ;;  %v630_v51 = vld [vmem:[#allocation7 + $0x248] sm:$0xff]  ;;  %v668_v52 = vld [vmem:[#allocation7 + $0x378] sm:$0xff] }
 0x1ce   :  { %705 = vmatpush.msrb.mxu0 %v561_v54  ;;  %725 = vmatpush.msrb.mxu1 %v593_v55  ;;  %v594_v53 = vld [vmem:[#allocation7 + $0x128] sm:$0xff]  ;;  %v628_v54 = vld [vmem:[#allocation7 + $0x238] sm:$0xff] }
 0x1cf   :  { %745 = vmatpush.msrb.mxu2 %v625_v56  ;;  %765 = vmatpush.msrb.mxu3 %v657_v57  ;;  %v666_v55 = vld [vmem:[#allocation7 + $0x368] sm:$0xff]  ;;  %v592_v56 = vld [vmem:[#allocation7 + $0x118] sm:$0xff] }
 0x1d0   :  { %706 = vmatpush.msrb.mxu0 %v559_v58  ;;  %726 = vmatpush.msrb.mxu1 %v591_v59  ;;  %v626_v57 = vld [vmem:[#allocation7 + $0x228] sm:$0xff]  ;;  %v664_v58 = vld [vmem:[#allocation7 + $0x358] sm:$0xff] }
 0x1d1   :  { %746 = vmatpush.msrb.mxu2 %v623_v60  ;;  %766 = vmatpush.msrb.mxu3 %v655_v11  ;;  %v590_v59 = vld [vmem:[#allocation7 + $0x108] sm:$0xff]  ;;  %v624_v60 = vld [vmem:[#allocation7 + $0x218] sm:$0xff] }
 0x1d2   :  { %707 = vmatpush.msrb.mxu0 %v557_v61  ;;  %727 = vmatpush.msrb.mxu1 %v589_v62  ;;  %v662_v61 = vld [vmem:[#allocation7 + $0x348] sm:$0xff] }
 0x1d3   :  { %747 = vmatpush.msrb.mxu2 %v621_v1  ;;  %767 = vmatpush.msrb.mxu3 %v653_v15  ;;  %v1046_v62 = vld [vmem:[%s1445_s3 + $0x3] ss:$8 sm:$0xf] }
 0x1d4   :  { %772 = vmatpush.msra.mxu0 %v588_v63  ;;  %792 = vmatpush.msra.mxu1 %v620_v0  ;;  %v622_v63 = vld [vmem:[#allocation7 + $0x208] sm:$0xff]  ;;  %v660_v0 = vld [vmem:[#allocation7 + $0x338] sm:$0xff] }
 0x1d5   :  { %812 = vmatpush.msra.mxu2 %v652_v4  ;;  %832 = vmatpush.msra.mxu3 %v684_v19  ;;  %v658_v1 = vld [vmem:[#allocation7 + $0x328] sm:$0xff] }
 0x1d6   :  { %773 = vmatpush.msra.mxu0 %v586_v2  ;;  %793 = vmatpush.msra.mxu1 %v618_v3  ;;  %v385_v2 = vperm.slane %v1046_v62, 0  ;;  %v656_v3 = vld [vmem:[#allocation7 + $0x318] sm:$0xff] }
 0x1d7   :  { %813 = vmatpush.msra.mxu2 %v650_v7  ;;  %833 = vmatpush.msra.mxu3 %v682_v23  ;;  %v867_v23 = vld [vmem:[#allocation8 + $0x68] sm:$0xff] }
 0x1d8   :  { %774 = vmatpush.msra.mxu0 %v584_v5  ;;  %794 = vmatpush.msra.mxu1 %v616_v6  ;;  %v654_v6 = vld [vmem:[#allocation7 + $0x308] sm:$0xff] }
 0x1d9   :  { %814 = vmatpush.msra.mxu2 %v648_v14  ;;  %834 = vmatpush.msra.mxu3 %v680_v27 }
 0x1da   :  { %775 = vmatpush.msra.mxu0 %v582_v8  ;;  %795 = vmatpush.msra.mxu1 %v614_v13 }
 0x1db   :  { %815 = vmatpush.msra.mxu2 %v646_v18  ;;  %835 = vmatpush.msra.mxu3 %v678_v31  ;;  %v869_v18 = vld [vmem:[#allocation8 + $0x78] sm:$0xff]  ;;  %v866_v31 = vld [vmem:[#allocation8 + $0x60] sm:$0xff] }
 0x1dc   :  { %776 = vmatpush.msra.mxu0 %v580_v9  ;;  %796 = vmatpush.msra.mxu1 %v612_v17  ;;  %v386_v9 = vperm.slane %v1046_v62, 1 }
 0x1dd   :  { %816 = vmatpush.msra.mxu2 %v644_v22  ;;  %836 = vmatpush.msra.mxu3 %v676_v35  ;;  %v868_v22 = vld [vmem:[#allocation8 + $0x70] sm:$0xff] }
 0x1de   :  { %777 = vmatpush.msra.mxu0 %v578_v10  ;;  %797 = vmatpush.msra.mxu1 %v610_v21  ;;  %v387_v10 = vperm.slane %v1046_v62, 2  ;;  %v388_v21 = vperm.slane %v1046_v62, 3  ;;  %v884_v35 = vld [vmem:[#allocation8 + $0xf0] sm:$0xff] }
 0x1df   :  { %817 = vmatpush.msra.mxu2 %v642_v26  ;;  %837 = vmatpush.msra.mxu3 %v674_v40  ;;  %v882_v40 = vld [vmem:[#allocation8 + $0xe0] sm:$0xff]  ;;  %v942_v62 = vld [vmem:[%s1452_s10 + $0x70] sm:$0xff] }
 0x1e0   :  { %778 = vmatpush.msra.mxu0 %v576_v12  ;;  %798 = vmatpush.msra.mxu1 %v608_v25 }
 0x1e1   :  { %818 = vmatpush.msra.mxu2 %v640_v30  ;;  %838 = vmatpush.msra.mxu3 %v672_v44  ;;  %v880_v44 = vld [vmem:[#allocation8 + $0xd0] sm:$0xff] }
 0x1e2   :  { %779 = vmatpush.msra.mxu0 %v574_v16  ;;  %799 = vmatpush.msra.mxu1 %v606_v29 }
 0x1e3   :  { %819 = vmatpush.msra.mxu2 %v638_v34  ;;  %839 = vmatpush.msra.mxu3 %v670_v48  ;;  %v864_v34 = vld [vmem:[#allocation8 + $0x50] sm:$0xff]  ;;  %v878_v48 = vld [vmem:[#allocation8 + $0xc0] sm:$0xff] }
 0x1e4   :  { %780 = vmatpush.msra.mxu0 %v572_v20  ;;  %800 = vmatpush.msra.mxu1 %v604_v33  ;;  %v885_v33 = vld [vmem:[#allocation8 + $0xf8] sm:$0xff] }
 0x1e5   :  { %820 = vmatpush.msra.mxu2 %v636_v38  ;;  %840 = vmatpush.msra.mxu3 %v668_v52  ;;  %v862_v38 = vld [vmem:[#allocation8 + $0x40] sm:$0xff]  ;;  %v876_v52 = vld [vmem:[#allocation8 + $0xb0] sm:$0xff] }
 0x1e6   :  { %781 = vmatpush.msra.mxu0 %v570_v24  ;;  %801 = vmatpush.msra.mxu1 %v602_v37  ;;  %v883_v37 = vld [vmem:[#allocation8 + $0xe8] sm:$0xff] }
 0x1e7   :  { %821 = vmatpush.msra.mxu2 %v634_v43  ;;  %841 = vmatpush.msra.mxu3 %v666_v55  ;;  %v860_v43 = vld [vmem:[#allocation8 + $0x30] sm:$0xff]  ;;  %v854_v55 = vld [vmem:[#allocation8] sm:$0xff] }
 0x1e8   :  { %782 = vmatpush.msra.mxu0 %v568_v28  ;;  %802 = vmatpush.msra.mxu1 %v600_v42  ;;  %v881_v42 = vld [vmem:[#allocation8 + $0xd8] sm:$0xff] }
 0x1e9   :  { %822 = vmatpush.msra.mxu2 %v632_v47  ;;  %842 = vmatpush.msra.mxu3 %v664_v58  ;;  %v858_v47 = vld [vmem:[#allocation8 + $0x20] sm:$0xff]  ;;  %v872_v58 = vld [vmem:[#allocation8 + $0x90] sm:$0xff] }
 0x1ea   :  { %783 = vmatpush.msra.mxu0 %v566_v32  ;;  %803 = vmatpush.msra.mxu1 %v598_v46  ;;  %v865_v32 = vld [vmem:[#allocation8 + $0x58] sm:$0xff]  ;;  %v879_v46 = vld [vmem:[#allocation8 + $0xc8] sm:$0xff] }
 0x1eb   :  { %823 = vmatpush.msra.mxu2 %v630_v51  ;;  %843 = vmatpush.msra.mxu3 %v662_v61  ;;  %v856_v51 = vld [vmem:[#allocation8 + $0x10] sm:$0xff]  ;;  %v943_v61 = vld [vmem:[%s1452_s10 + $0x78] sm:$0xff] }
 0x1ec   :  { %784 = vmatpush.msra.mxu0 %v564_v36  ;;  %804 = vmatpush.msra.mxu1 %v596_v50  ;;  %v863_v36 = vld [vmem:[#allocation8 + $0x48] sm:$0xff]  ;;  %v877_v50 = vld [vmem:[#allocation8 + $0xb8] sm:$0xff] }
 0x1ed   :  { %824 = vmatpush.msra.mxu2 %v628_v54  ;;  %844 = vmatpush.msra.mxu3 %v660_v0  ;;  %v875_v54 = vld [vmem:[#allocation8 + $0xa8] sm:$0xff]  ;;  %v940_v0 = vld [vmem:[%s1452_s10 + $0x60] sm:$0xff] }
 0x1ee   :  { %785 = vmatpush.msra.mxu0 %v562_v41  ;;  %805 = vmatpush.msra.mxu1 %v594_v53  ;;  %v861_v41 = vld [vmem:[#allocation8 + $0x38] sm:$0xff]  ;;  %v855_v53 = vld [vmem:[#allocation8 + $0x8] sm:$0xff] }
 0x1ef   :  { %825 = vmatpush.msra.mxu2 %v626_v57  ;;  %845 = vmatpush.msra.mxu3 %v658_v1  ;;  %v873_v57 = vld [vmem:[#allocation8 + $0x98] sm:$0xff] }
 0x1f0   :  { %786 = vmatpush.msra.mxu0 %v560_v45  ;;  %806 = vmatpush.msra.mxu1 %v592_v56  ;;  %v859_v45 = vld [vmem:[#allocation8 + $0x28] sm:$0xff]  ;;  %v874_v56 = vld [vmem:[#allocation8 + $0xa0] sm:$0xff]  ;;  %v939_v1 = vld [vmem:[%s1452_s10 + $0x58] sm:$0xff] }
 0x1f1   :  { %826 = vmatpush.msra.mxu2 %v624_v60  ;;  %846 = vmatpush.msra.mxu3 %v656_v3  ;;  %v870_v60 = vld [vmem:[#allocation8 + $0x80] sm:$0xff]  ;;  %v938_v3 = vld [vmem:[%s1452_s10 + $0x50] sm:$0xff] }
 0x1f2   :  { %787 = vmatpush.msra.mxu0 %v558_v49  ;;  %807 = vmatpush.msra.mxu1 %v590_v59  ;;  %v857_v49 = vld [vmem:[#allocation8 + $0x18] sm:$0xff]  ;;  %v871_v59 = vld [vmem:[#allocation8 + $0x88] sm:$0xff] }
 0x1f3   :  { %827 = vmatpush.msra.mxu2 %v622_v63  ;;  %847 = vmatpush.msra.mxu3 %v654_v6  ;;  %v941_v63 = vld [vmem:[%s1452_s10 + $0x68] sm:$0xff] }
 0x1f4   :  { %v937_v6 = vld [vmem:[%s1452_s10 + $0x48] sm:$0xff] }
 0x22d   :  { %v410_v4 = vpop.f32.mrf.mxu0  ;;  %v430_v5 = vpop.f32.mrf.mxu1 }
 0x22e   :  { %v411_v7 = vadd.f32 %v410_v4, %v385_v2  ;;  %v1047_v2 = vld [vmem:[%s1445_s3 + $0x4] ss:$8 sm:$0x3] }
 0x230   :  { %v431_v8 = vadd.f32 %v430_v5, %v411_v7  ;;  %v688_v5 = vperm.slane %v1047_v2, 0 }
 0x232   :  { %1067 = vtanh.f32 %v431_v8  ;;  %v936_v8 = vld [vmem:[%s1452_s10 + $0x40] sm:$0xff] }
 0x234   :  { %v450_v11 = vpop.f32.mrf.mxu2  ;;  %v470_v12 = vpop.f32.mrf.mxu3 }
 0x235   :  { %v451_v13 = vadd.f32 %v450_v11, %v386_v9  ;;  %v490_v14 = vpop.f32.mrf.mxu0  ;;  %v510_v17 = vpop.f32.mrf.mxu1  ;;  %v935_v11 = vld [vmem:[%s1452_s10 + $0x38] sm:$0xff] }
 0x236   :  { %v491_v15 = vadd.f32 %v490_v14, %v387_v10 }
 0x237   :  { %v471_v16 = vadd.f32 %v470_v12, %v451_v13  ;;  %v689_v13 = vperm.slane %v1047_v2, 1 }
 0x238   :  { %v1068_v19 = vpop.eup %1067  ;;  %v511_v20 = vadd.f32 %v510_v17, %v491_v15 }
 0x239   :  { %1069 = vtanh.f32 %v471_v16  ;;  %708 = vmatmul.f32.vlgmr.msrb.gmra.mxu0 %v1068_v19 }
 0x23a   :  { %1071 = vtanh.f32 %v511_v20  ;;  %887 = vmatpush.msrb.mxu0 %v869_v18 }
 0x23c   :  { %v530_v24 = vpop.f32.mrf.mxu2  ;;  %888 = vmatpush.msrb.mxu0 %v868_v22  ;;  %v550_v26 = vpop.f32.mrf.mxu3 }
 0x23d   :  { %v531_v25 = vadd.f32 %v530_v24, %v388_v21 }
 0x23e   :  { %889 = vmatpush.msrb.mxu0 %v867_v23 }
 0x23f   :  { %v1070_v27 = vpop.eup %1069  ;;  %v551_v28 = vadd.f32 %v550_v26, %v531_v25 }
 0x240   :  { %v1072_v29 = vpop.eup %1071  ;;  %728 = vmatmul.f32.vlgmr.msrb.gmra.mxu1 %v1070_v27  ;;  %890 = vmatpush.msrb.mxu0 %v866_v31  ;;  %v930_v31 = vld [vmem:[%s1452_s10 + $0x10] sm:$0xff] }
 0x241   :  { %1073 = vtanh.f32 %v551_v28  ;;  %748 = vmatmul.f32.vlgmr.msrb.gmra.mxu2 %v1072_v29  ;;  %788 = vmatmul.f32.vlgmr.msra.gmra.mxu0 %v1068_v19  ;;  %v933_v28 = vld [vmem:[%s1452_s10 + $0x28] sm:$0xff] }
 0x242   :  { %907 = vmatpush.msrb.mxu1 %v885_v33  ;;  %891 = vmatpush.msrb.mxu0 %v865_v32  ;;  %v929_v32 = vld [vmem:[%s1452_s10 + $0x8] sm:$0xff]  ;;  %v928_v33 = vld [vmem:[%s1452_s10] sm:$0xff] }
 0x243   :  { %945 = vmatpush.msrb.mxu2 %v943_v61  ;;  %v1062_v61 = vld [vmem:[%s1444_s2] ss:$0 sm:$0xff] }
 0x244   :  { %908 = vmatpush.msrb.mxu1 %v884_v35  ;;  %892 = vmatpush.msrb.mxu0 %v864_v34  ;;  %v973_v34 = vld [vmem:[%s1453_s11 + $0x38] sm:$0xff]  ;;  %v972_v35 = vld [vmem:[%s1453_s11 + $0x30] sm:$0xff] }
 0x245   :  { %946 = vmatpush.msrb.mxu2 %v942_v62 }
 0x246   :  { %893 = vmatpush.msrb.mxu0 %v863_v36  ;;  %909 = vmatpush.msrb.mxu1 %v883_v37  ;;  %v971_v36 = vld [vmem:[%s1453_s11 + $0x28] sm:$0xff]  ;;  %v886_v37 = vld [vmem:[%s1445_s3 + $0x5] ss:$0 sm:$0xff] }
 0x247   :  { %v1074_v30 = vpop.eup %1073  ;;  %947 = vmatpush.msrb.mxu2 %v941_v63 }
 0x248   :  { %768 = vmatmul.f32.vlgmr.msrb.gmra.mxu3 %v1074_v30  ;;  %808 = vmatmul.f32.vlgmr.msra.gmra.mxu1 %v1070_v27  ;;  %v934_v27 = vld [vmem:[%s1452_s10 + $0x30] sm:$0xff] }
 0x249   :  { %828 = vmatmul.f32.vlgmr.msra.gmra.mxu2 %v1072_v29  ;;  %894 = vmatpush.msrb.mxu0 %v862_v38  ;;  %v932_v29 = vld [vmem:[%s1452_s10 + $0x20] sm:$0xff] }
 0x24a   :  { %910 = vmatpush.msrb.mxu1 %v882_v40  ;;  %948 = vmatpush.msrb.mxu2 %v940_v0 }
 0x24b   :  { %895 = vmatpush.msrb.mxu0 %v861_v41  ;;  %986 = vmatpush.msrb.mxu3 %v973_v34 }
 0x24c   :  { %911 = vmatpush.msrb.mxu1 %v881_v42  ;;  %949 = vmatpush.msrb.mxu2 %v939_v1 }
 0x24d   :  { %896 = vmatpush.msrb.mxu0 %v860_v43  ;;  %987 = vmatpush.msrb.mxu3 %v972_v35 }
 0x24e   :  { %912 = vmatpush.msrb.mxu1 %v880_v44  ;;  %950 = vmatpush.msrb.mxu2 %v938_v3  ;;  %v970_v44 = vld [vmem:[%s1453_s11 + $0x20] sm:$0xff] }
 0x24f   :  { %897 = vmatpush.msrb.mxu0 %v859_v45  ;;  %988 = vmatpush.msrb.mxu3 %v971_v36  ;;  %v969_v45 = vld [vmem:[%s1453_s11 + $0x18] sm:$0xff] }
 0x250   :  { %848 = vmatmul.f32.vlgmr.msra.gmra.mxu3 %v1074_v30  ;;  %913 = vmatpush.msrb.mxu1 %v879_v46  ;;  %v931_v30 = vld [vmem:[%s1452_s10 + $0x18] sm:$0xff]  ;;  %v968_v46 = vld [vmem:[%s1453_s11 + $0x10] sm:$0xff] }
 0x251   :  { %898 = vmatpush.msrb.mxu0 %v858_v47  ;;  %951 = vmatpush.msrb.mxu2 %v937_v6  ;;  %v967_v47 = vld [vmem:[%s1453_s11 + $0x8] sm:$0xff] }
 0x252   :  { %914 = vmatpush.msrb.mxu1 %v878_v48  ;;  %989 = vmatpush.msrb.mxu3 %v970_v44  ;;  %v966_v48 = vld [vmem:[%s1453_s11] sm:$0xff] }
 0x253   :  { %899 = vmatpush.msrb.mxu0 %v857_v49  ;;  %952 = vmatpush.msrb.mxu2 %v936_v8  ;;  %v944_v49 = vld [vmem:[%s1445_s3 + $0x6] ss:$0 sm:$0xff] }
 0x254   :  { %915 = vmatpush.msrb.mxu1 %v877_v50  ;;  %990 = vmatpush.msrb.mxu3 %v969_v45 }
 0x255   :  { %900 = vmatpush.msrb.mxu0 %v856_v51  ;;  %953 = vmatpush.msrb.mxu2 %v935_v11 }
 0x256   :  { %916 = vmatpush.msrb.mxu1 %v876_v52  ;;  %991 = vmatpush.msrb.mxu3 %v968_v46 }
 0x257   :  { %901 = vmatpush.msrb.mxu0 %v855_v53  ;;  %954 = vmatpush.msrb.mxu2 %v934_v27  ;;  %v1217_v53 = vmov 4  }
 0x258   :  { %917 = vmatpush.msrb.mxu1 %v875_v54  ;;  %992 = vmatpush.msrb.mxu3 %v967_v47  ;;  %v974_v54 = vld [vmem:[%s1445_s3 + $0x7] ss:$0 sm:$0xff]  ;;  %s1218_s3 = smov [#allocation10]  }
 0x259   :  { %902 = vmatpush.msrb.mxu0 %v854_v55  ;;  %955 = vmatpush.msrb.mxu2 %v933_v28  ;;  %s1029_s0 = sshll.u32 %s1218_s3, 4  ;;  %s1030_s0 = int_to_ptr.vmem [resolvable:$true] %s1029_s0 }
 0x25a   :  { %918 = vmatpush.msrb.mxu1 %v874_v56  ;;  %993 = vmatpush.msrb.mxu3 %v966_v48 }
 0x25b   :  { %956 = vmatpush.msrb.mxu2 %v932_v29  ;;  %1061 = vset.pattern.permute.xlu0 %v1217_v53 }
 0x25c   :  { %919 = vmatpush.msrb.mxu1 %v873_v57  ;;  %v1001_v57 = vld [vmem:[%s1443_s1] sm:$0xff] }
 0x25d   :  { %957 = vmatpush.msrb.mxu2 %v931_v30 }
 0x25e   :  { %920 = vmatpush.msrb.mxu1 %v872_v58 }
 0x25f   :  { %958 = vmatpush.msrb.mxu2 %v930_v31 }
 0x260   :  { %921 = vmatpush.msrb.mxu1 %v871_v59 }
 0x261   :  { %959 = vmatpush.msrb.mxu2 %v929_v32 }
 0x262   :  { %922 = vmatpush.msrb.mxu1 %v870_v60 }
 0x263   :  { %960 = vmatpush.msrb.mxu2 %v928_v33 }
 0x2b6   :  { %v709_v4 = vpop.f32.mrf.mxu0 }
 0x2b7   :  { %v710_v10 = vadd.f32 %v709_v4, %v688_v5 }
 0x2bd   :  { %v729_v7 = vpop.f32.mrf.mxu1 }
 0x2be   :  { %v730_v12 = vadd.f32 %v729_v7, %v710_v10  ;;  %v789_v15 = vpop.f32.mrf.mxu0 }
 0x2bf   :  { %v790_v19 = vadd.f32 %v789_v15, %v689_v13 }
 0x2c4   :  { %v749_v9 = vpop.f32.mrf.mxu2 }
 0x2c5   :  { %v750_v14 = vadd.f32 %v749_v9, %v730_v12  ;;  %v809_v18 = vpop.f32.mrf.mxu1 }
 0x2c6   :  { %v810_v22 = vadd.f32 %v809_v18, %v790_v19 }
 0x2cb   :  { %v769_v16 = vpop.f32.mrf.mxu3 }
 0x2cc   :  { %v770_v17 = vadd.f32 %v769_v16, %v750_v14  ;;  %v829_v21 = vpop.f32.mrf.mxu2 }
 0x2cd   :  { %v830_v23 = vadd.f32 %v829_v21, %v810_v22 }
 0x2ce   :  { %v852_v20 = vmax.f32 %v770_v17, 0.0 }
 0x2d0   :  { %903 = vmatmul.f32.vlgmr.msrb.gmra.mxu0 %v852_v20 }
 0x2d3   :  { %v849_v24 = vpop.f32.mrf.mxu3 }
 0x2d4   :  { %v850_v25 = vadd.f32 %v849_v24, %v830_v23 }
 0x2d6   :  { %v853_v26 = vmax.f32 %v850_v25, 0.0 }
 0x2d8   :  { %923 = vmatmul.f32.vlgmr.msrb.gmra.mxu1 %v853_v26 }
 0x34d   :  { %v904_v38 = vpop.f32.mrf.mxu0 }
 0x34e   :  { %v905_v40 = vadd.f32 %v904_v38, %v886_v37 }
 0x355   :  { %v924_v41 = vpop.f32.mrf.mxu1 }
 0x356   :  { %v925_v42 = vadd.f32 %v924_v41, %v905_v40 }
 0x358   :  { %v927_v43 = vmax.f32 %v925_v42, 0.0 }
 0x35a   :  { %961 = vmatmul.f32.vlgmr.msrb.gmra.mxu2 %v927_v43 }
 0x3dd   :  { %v962_v50 = vpop.f32.mrf.mxu2 }
 0x3de   :  { %v963_v51 = vadd.f32 %v962_v50, %v944_v49 }
 0x3e0   :  { %1075 = vtanh.f32 %v963_v51 }
 0x3e6   :  { %v1076_v52 = vpop.eup %1075 }
 0x3e7   :  { %1048 = vmatmul.msk.f32.vlgmr.msrb.gmra.mxu3 %vm143_vm1, %v1076_v52 }
 0x46a   :  { %v995_v55 = vpop.f32.mrf.mxu3 }
 0x46b   :  { %v996_v56 = vadd.f32 %v995_v55, %v974_v54 }
 0x46d   :  { %1077 = vtanh.f32 %v996_v56 }
 0x473   :  { %v1078_v58 = vpop.eup %1077 }
 0x474   :  { %v1000_v59 = vsel %vm998_vm3, %v1078_v58, %v996_v56 }
 0x475   :  { %v1002_v60 = vsub.f32 %v1001_v57, %v1000_v59 }
 0x477   :  { %v1003_v62 = vmul.f32 %v1002_v60, %v1002_v60 }
 0x479   :  { %v1008_v63 = vmul.f32 %v1062_v61, %v1003_v62 }
 0x47b   :  { %v1010_v0 = vsel %vm1009_vm4, %v1008_v63, 0.0 }
 0x47c   :  { %1011 = vadd.xlane.f32.xlu0 %v1010_v0 }
 0x490   :  { %1017 = vperm.xlu0 %1061, %v1000_v59  }
 0x4ef   :  { %v1012_v1 = vpop.xlane.xlu0 %1011 }
 0x502   :  { %v1018_v2 = vpop.permute.xlu0 %1017 }
 0x503   :  { %v1020_v3 = vsel %vm1014_vm5, %v1018_v2, 0.0 }
 0x504   :  { %v1021_v4 = vsel %vm1013_vm6, %v1012_v1, %v1020_v3 }
 0x505   :  { %1023 = vst.msk [vmem:[#allocation10] sm:$0xff] %vm1022_vm7, %v1021_v4 }
 0x506   :  { %1034 = dma.vmem_to_hbm [thread:$0]  %s1030_s0, 128, %s1032_s19, [#allocation4]  }
 0x507   :  { %1205 = dma.done.wait [#allocation4], 128  }
 0x508   :  { %1206 = vsyncadd [#allocation4], 4294967168 }
 0x509   :  { %1039 = vsyncpa [#allocation3], 1 }
 0x50a   :  { %1040 = vsyncpa [#allocation6], 1 }
 0x50b   :  { %1041 = vsyncpa [#allocation9], 1 }
 0x50c   :  { %1042 = vsyncpa [#allocation4], 1 }

</bundles_post_ra>
